<compile_context>
chip_gen: v6e
topology: v6e:2x2x1
jax: 0.10.0
libtpu: 0.0.40
codegen_flags: <defaults>
</compile_context>

<pallas_src>
import jax
import jax.numpy as jnp
from jax.experimental import pallas as pl
from jax.experimental.pallas import tpu as pltpu


def _round_up(x, n):
    return ((x + n - 1) // n) * n


def _bengio_kernel(x_ref, w_in_ref, b_in_ref, w_dec_ref, b_dec_ref,
                   logits_ref, lse_ref, hid_ref, m_ref, l_ref):
    """Grid = (m_tiles, vocab_tiles); the vocab axis carries the online lse.

    x_ref     : (Mt, Kp)  bf16  unfolded [window_0..window_{L-1}, ivec] features
    w_in_ref  : (Kp, Hp)  bf16  stacked [w_e2h_0; ..; w_e2h_{L-1}; w_iv]
    b_in_ref  : (1, Hp)   f32   sum_i b_e2h_i + b_iv
    w_dec_ref : (Hp, Vt)  bf16  decoder weight tile
    b_dec_ref : (1, Vt)   f32   decoder bias tile (-1e30 on padded vocab cols)
    logits_ref: (Mt, Vt)  bf16  unnormalized logits (lse subtracted by wrapper)
    lse_ref   : (Mt, 1)   f32   per-row log-sum-exp (written at last vocab tile)
    hid_ref   : (Mt, Hp)  bf16  scratch: tanh hidden, resident across vocab axis
    m_ref/l_ref:(Mt, 1)   f32   scratch: running max / running sum
    """
    j = pl.program_id(1)

    @pl.when(j == 0)
    def _():
        # Single fused MXU pass: K = in_len*E + ivec_dim (windows + ivec).
        acc = jnp.dot(x_ref[...], w_in_ref[...],
                      preferred_element_type=jnp.float32)
        hid_ref[...] = jnp.tanh(acc + b_in_ref[...]).astype(hid_ref.dtype)
        # -1e30 (not -inf) so exp(m_prev - m_new) never produces NaN.
        m_ref[...] = jnp.full(m_ref.shape, -1e30, jnp.float32)
        l_ref[...] = jnp.zeros(l_ref.shape, jnp.float32)

    # Decoder tile: (Mt, Hp) @ (Hp, Vt), bf16 inputs, f32 accumulation.
    logits = jnp.dot(hid_ref[...], w_dec_ref[...],
                     preferred_element_type=jnp.float32) + b_dec_ref[...]
    logits_ref[...] = logits.astype(logits_ref.dtype)

    # Online log-sum-exp across vocab tiles (flash-style, f32 scratch).
    m_prev = m_ref[...]
    m_new = jnp.maximum(m_prev, jnp.max(logits, axis=-1, keepdims=True))
    l_ref[...] = (l_ref[...] * jnp.exp(m_prev - m_new)
                  + jnp.sum(jnp.exp(logits - m_new), axis=-1, keepdims=True))
    m_ref[...] = m_new

    @pl.when(j == pl.num_programs(1) - 1)
    def _():
        lse_ref[...] = m_ref[...] + jnp.log(l_ref[...])


def pack_params(params, *, in_len, block_v=2048):
    """One-time repacking of module parameters into MXU/DMA-friendly layout."""
    emb_table = params["encoder"]          # (ntoken, E) f32
    w_e2h = params["w_e2h"]                # (in_len, E, H)  (in, out layout)
    b_e2h = params["b_e2h"]                # (in_len, H)
    w_iv = params["w_iv"]                  # (ivec_dim, H)
    b_iv = params["b_iv"]                  # (1, H)
    w_dec = params["w_dec"]                # (H, ntoken)
    b_dec = params["b_dec"]                # (1, ntoken)

    ntoken, E = emb_table.shape
    ivec_dim, H = w_iv.shape
    K = in_len * E + ivec_dim
    Kp = _round_up(K, 128)
    Hp = _round_up(H, 128)
    Vp = _round_up(ntoken, 128)
    Vt = min(_round_up(block_v, 128), Vp)
    V_pad = _round_up(Vp, Vt)

    # Fused input projection weight: rows [w_e2h_0; ..; w_e2h_{L-1}; w_iv; 0].
    w_in = jnp.concatenate([w_e2h.reshape(in_len * E, H), w_iv], axis=0)
    w_in = jnp.pad(w_in, ((0, Kp - K), (0, Hp - H))).astype(jnp.bfloat16)
    b_in = jnp.pad(jnp.sum(b_e2h, axis=0, keepdims=True) + b_iv,
                   ((0, 0), (0, Hp - H))).astype(jnp.float32)

    w_dec_p = jnp.pad(w_dec, ((0, Hp - H),
                              (0, V_pad - ntoken))).astype(jnp.bfloat16)
    # Padded vocab columns get -1e30 bias so exp() of them is exactly 0.
    b_dec_p = jnp.pad(b_dec.astype(jnp.float32),
                      ((0, 0), (0, V_pad - ntoken)), constant_values=-1e30)

    return {
        "emb_bf16": emb_table.astype(jnp.bfloat16),
        "w_in": w_in, "b_in": b_in,
        "w_dec": w_dec_p, "b_dec": b_dec_p,
        "dims": (ntoken, E, H, ivec_dim, K, Kp, Hp, Vt, V_pad),
    }


def _vmem_budget_bytes(default_bytes=48 * 1024 * 1024):
    """~75% of physical VMEM (leaves internal-scratch headroom per the review:
    ~96 MiB on 128-MiB v5e/v6e, ~48 MiB on 64-MiB v7x)."""
    budget = default_bytes
    try:
        cap = int(getattr(pltpu.get_tpu_info(), "vmem_capacity_bytes", 0) or 0)
        if cap > 0:
            budget = (cap * 3) // 4
    except Exception:
        budget = default_bytes
    return max(int(budget), 32 * 1024 * 1024)


def _pipeline_vmem_estimate(mt, vt, kp, hp):
    """Rough VMEM footprint of the pallas_call pipeline (bytes)."""
    return (2 * mt * kp * 2            # x tile, bf16, double buffered
            + kp * hp * 2 + hp * 4     # w_in / b_in, single buffered
            + 2 * hp * vt * 2          # w_dec tile, bf16, double buffered
            + 2 * vt * 4               # b_dec tile, f32, double buffered
            + 2 * mt * vt * 2          # bf16 logits out, double buffered
            + 2 * mt * 4               # lse out, double buffered
            + mt * hp * 2 + 2 * mt * 4)  # hid / m / l scratch


def bengio_ivec_forward(token_ids, hidden, ivec, packed, *, in_len,
                        block_m=512):
    """Forward pass. Returns (log_probs (B, T, ntoken), hidden)."""
    ntoken, E, H, ivec_dim, K, Kp, Hp, Vt, V_pad = packed["dims"]
    if ivec.ndim == 1:
        ivec = ivec[None, :]

    B, S = token_ids.shape
    T = S - in_len + 1
    M = B * T

    # Glue: embedding gather + window unfold + (B,T)->M flattening, so the
    # kernel sees one big (M, K) feature matrix.
    emb = packed["emb_bf16"][token_ids]                       # (B, S, E) bf16
    windows = [emb[:, i:i + T, :] for i in range(in_len)]
    iv_b = jnp.broadcast_to(ivec[:, None, :].astype(jnp.bfloat16),
                            (B, T, ivec_dim))
    x = jnp.concatenate(windows + [iv_b], axis=-1).reshape(M, K)

    # ---- tile-size selection ------------------------------------------------
    Mt = min(block_m, _round_up(M, 16))
    # v7x has 2 TCs/chip: keep >= 2 M-tiles on the "parallel" axis so both
    # cores get work (prefer a smaller Mt over a single M-tile).
    if _round_up(M, Mt) // Mt < 2 and M > 16:
        Mt = max(16, _round_up(-(-M // 2), 16))
    # Fit the pipeline into the per-chip VMEM budget (handles v7x's 64 MiB).
    budget = _vmem_budget_bytes()
    while (_pipeline_vmem_estimate(Mt, Vt, Kp, Hp) > budget
           and Vt >= 512 and Vt % 256 == 0):
        Vt //= 2                      # any divisor of Vt still divides V_pad
    while _pipeline_vmem_estimate(Mt, Vt, Kp, Hp) > budget and Mt > 64:
        Mt = _round_up(Mt // 2, 16)
    M_pad = _round_up(M, Mt)

    x = jnp.pad(x, ((0, M_pad - M), (0, Kp - K)))
    grid = (M_pad // Mt, V_pad // Vt)

    def _call(single_buffer_consts):
        const_mode = ({"pipeline_mode": pl.Buffered(1)}
                      if single_buffer_consts else {})
        return pl.pallas_call(
            _bengio_kernel,
            out_shape=(jax.ShapeDtypeStruct((M_pad, V_pad), jnp.bfloat16),
                       jax.ShapeDtypeStruct((M_pad, 1), jnp.float32)),
            grid_spec=pltpu.PrefetchScalarGridSpec(
                num_scalar_prefetch=0,
                grid=grid,
                in_specs=[
                    pl.BlockSpec((Mt, Kp), lambda i, j: (i, 0)),   # x features
                    pl.BlockSpec((Kp, Hp), lambda i, j: (0, 0),    # w_in
                                 **const_mode),
                    pl.BlockSpec((1, Hp), lambda i, j: (0, 0),     # b_in
                                 **const_mode),
                    # TODO(synk): sweep pipeline_mode=pl.Buffered(3) on w_dec
                    # if profiling shows exposed DMA at vocab-tile boundaries.
                    pl.BlockSpec((Hp, Vt), lambda i, j: (0, j)),   # w_dec tile
                    pl.BlockSpec((1, Vt), lambda i, j: (0, j)),    # b_dec tile
                ],
                out_specs=(
                    pl.BlockSpec((Mt, Vt), lambda i, j: (i, j)),   # raw logits
                    pl.BlockSpec((Mt, 1), lambda i, j: (i, 0)),    # lse
                ),
                scratch_shapes=[
                    pltpu.VMEM((Mt, Hp), jnp.bfloat16),            # tanh hidden
                    pltpu.VMEM((Mt, 1), jnp.float32),              # running max
                    pltpu.VMEM((Mt, 1), jnp.float32),              # running sum
                ]),
            compiler_params=pltpu.CompilerParams(
                dimension_semantics=("parallel", "arbitrary"),
                vmem_limit_bytes=int(budget)),
        )(x, packed["w_in"], packed["b_in"], packed["w_dec"], packed["b_dec"])

    try:
        logits, lse = _call(True)
    except Exception:
        # Graceful fallback for jax builds that reject single-buffered specs;
        # identical semantics, just default double-buffering of w_in/b_in.
        logits, lse = _call(False)

    # Final normalization (lse was computed online, in f32, in the kernel).
    log_probs = (logits[:M, :ntoken].astype(jnp.float32)
                 - lse[:M]).reshape(B, T, ntoken)
    return log_probs, hidden


def init_params(key, *, ntoken, emb_size, in_len, nb_hidden, ivec_dim):
    """Deterministic synthetic parameters (shapes match the PyTorch module)."""
    ks = jax.random.split(key, 6)
    initrange = 0.1
    u = lambda k, shape: jax.random.uniform(
        k, shape, jnp.float32, minval=-initrange, maxval=initrange)
    return {
        "encoder": u(ks[0], (ntoken, emb_size)),
        # emb2h weights: PyTorch stores (H, E); we store transposed (E, H).
        "w_e2h": u(ks[1], (in_len, emb_size, nb_hidden)),
        "b_e2h": u(ks[2], (in_len, nb_hidden)),
        "w_iv": u(ks[3], (ivec_dim, nb_hidden)),
        "b_iv": u(ks[4], (1, nb_hidden)),
        "w_dec": u(ks[5], (nb_hidden, ntoken)),
        "b_dec": jnp.zeros((1, ntoken), jnp.float32),  # decoder.bias.fill_(0)
    }


def reference_forward(token_ids, hidden, ivec, params, *, in_len):
    """Pure-jnp f32 reference (original module semantics)."""
    if ivec.ndim == 1:
        ivec = ivec[None, :]
    emb = params["encoder"][token_ids]                 # (B, S, E)
    S = emb.shape[1]
    T = S - in_len + 1
    projs = [
        jnp.einsum("bte,eh->bth", emb[:, i:i + T], params["w_e2h"][i])
        + params["b_e2h"][i]
        for i in range(in_len)
    ]
    ivec_proj = ivec @ params["w_iv"] + params["b_iv"]          # (B, H)
    out = jnp.tanh(sum(projs) + ivec_proj[:, None, :])
    logits = jnp.einsum("bth,hn->btn", out, params["w_dec"]) + params["b_dec"]
    return jax.nn.log_softmax(logits, axis=-1), hidden


if __name__ == "__main__":
    # Small shapes consistent with the module's forward.
    ntoken, emb_size, in_len, nb_hidden, ivec_dim = 1024, 32, 3, 64, 16
    batch, seq = 4, 12          # T = 10, M = B*T = 40

    key = jax.random.PRNGKey(0)
    k_par, k_tok, k_iv = jax.random.split(key, 3)

    params = init_params(k_par, ntoken=ntoken, emb_size=emb_size,
                         in_len=in_len, nb_hidden=nb_hidden, ivec_dim=ivec_dim)
    token_ids = jax.random.randint(k_tok, (batch, seq), 0, ntoken, jnp.int32)
    ivec = jax.random.normal(k_iv, (batch, ivec_dim), jnp.float32)
    hidden0 = jnp.zeros((1, batch, nb_hidden), jnp.float32)  # init_hidden

    # block_v=512 so the test exercises >1 vocab tile of the online-lse path;
    # M=40 also exercises >1 M-tile (grid[0]=2) of the resident-scratch path.
    packed = pack_params(params, in_len=in_len, block_v=512)

    log_probs, hidden_out = bengio_ivec_forward(
        token_ids, hidden0, ivec, packed, in_len=in_len)
    log_probs = jax.block_until_ready(log_probs)

    ref_log_probs, _ = reference_forward(
        token_ids, hidden0, ivec, params, in_len=in_len)

    T = seq - in_len + 1
    assert log_probs.shape == (batch, T, ntoken)
    # Rows must be exact log-probabilities (validates the online lse).
    assert jnp.allclose(jnp.sum(jnp.exp(log_probs), axis=-1), 1.0, atol=1e-3)
    # bf16 matmul inputs / bf16 logits (f32 accumulation) vs. f32 reference.
    max_err = float(jnp.max(jnp.abs(log_probs - ref_log_probs)))
    assert jnp.allclose(log_probs, ref_log_probs, atol=3e-2, rtol=0.0), max_err

    print("KERNEL_OK")
</pallas_src>

<mosaic_0001>
module attributes {stable_mosaic.version = 11 : i64} {
  func.func @_bengio_kernel(%arg0: i32, %arg1: i32, %arg2: memref<32x128xbf16, #tpu.memory_space<vmem>>, %arg3: memref<128x128xbf16, #tpu.memory_space<vmem>>, %arg4: memref<1x128xf32, #tpu.memory_space<vmem>>, %arg5: memref<128x512xbf16, #tpu.memory_space<vmem>>, %arg6: memref<1x512xf32, #tpu.memory_space<vmem>>, %arg7: memref<32x512xbf16, #tpu.memory_space<vmem>>, %arg8: memref<32x1xf32, #tpu.memory_space<vmem>>, %arg9: memref<32x128xbf16, #tpu.memory_space<vmem>>, %arg10: memref<32x1xf32, #tpu.memory_space<vmem>>, %arg11: memref<32x1xf32, #tpu.memory_space<vmem>>) attributes {dimension_semantics = [#tpu.dimension_semantics<parallel>, #tpu.dimension_semantics<arbitrary>], iteration_bounds = array<i64: 2, 2>, scalar_prefetch = 0 : i64, scratch_operands = 3 : i64, tpu.core_type = #tpu.core_type<tc>, window_params = [{transform_indices = @transform_0, window_bounds = array<i64: 32, 128>}, {pipeline_mode = #tpu.pipeline_mode<synchronous>, transform_indices = @transform_1, window_bounds = array<i64: 128, 128>}, {pipeline_mode = #tpu.pipeline_mode<synchronous>, transform_indices = @transform_2, window_bounds = array<i64: 1, 128>}, {transform_indices = @transform_3, window_bounds = array<i64: 128, 512>}, {transform_indices = @transform_4, window_bounds = array<i64: 1, 512>}, {transform_indices = @transform_5, window_bounds = array<i64: 32, 512>}, {transform_indices = @transform_6, window_bounds = array<i64: 32, 1>}]} {
    %c0_i32 = arith.constant 0 : i32
    %0 = arith.cmpi eq, %arg1, %c0_i32 : i32
    %1 = arith.extui %0 : i1 to i32
    %c0_i32_0 = arith.constant 0 : i32
    %2 = arith.cmpi ne, %1, %c0_i32_0 : i32
    scf.if %2 {
      %c0_19 = arith.constant 0 : index
      %c0_20 = arith.constant 0 : index
      %30 = vector.load %arg2[%c0_19, %c0_20] : memref<32x128xbf16, #tpu.memory_space<vmem>>, vector<32x128xbf16>
      %c0_21 = arith.constant 0 : index
      %c0_22 = arith.constant 0 : index
      %31 = vector.load %arg3[%c0_21, %c0_22] : memref<128x128xbf16, #tpu.memory_space<vmem>>, vector<128x128xbf16>
      %cst_23 = arith.constant dense<0.000000e+00> : vector<32x128xf32>
      %32 = tpu.matmul %30, %31, %cst_23 {dimension_numbers = #tpu.dot_dimension_numbers<[1], [0], [0], [1], [0, 0, 1, 1], [], []>} : vector<32x128xbf16>, vector<128x128xbf16>, vector<32x128xf32> -> vector<32x128xf32>
      %c0_24 = arith.constant 0 : index
      %c0_25 = arith.constant 0 : index
      %33 = vector.load %arg4[%c0_24, %c0_25] : memref<1x128xf32, #tpu.memory_space<vmem>>, vector<1x128xf32>
      %34 = vector.broadcast %33 : vector<1x128xf32> to vector<32x128xf32>
      %35 = arith.addf %32, %34 : vector<32x128xf32>
      %36 = math.tanh %35 : vector<32x128xf32>
      %37 = arith.truncf %36 : vector<32x128xf32> to vector<32x128xbf16>
      %c0_26 = arith.constant 0 : index
      %c0_27 = arith.constant 0 : index
      %38 = vector.load %arg9[%c0_26, %c0_27] : memref<32x128xbf16, #tpu.memory_space<vmem>>, vector<32x128xbf16>
      tpu.vector_store %arg9[%c0_26, %c0_27], %37 {strides = array<i32>} : memref<32x128xbf16, #tpu.memory_space<vmem>>, vector<32x128xbf16>,
      %cst_28 = arith.constant -1.000000e+30 : f32
      %39 = vector.broadcast %cst_28 : f32 to vector<32x1xf32>
      %c0_29 = arith.constant 0 : index
      %c0_30 = arith.constant 0 : index
      %40 = vector.load %arg10[%c0_29, %c0_30] : memref<32x1xf32, #tpu.memory_space<vmem>>, vector<32x1xf32>
      tpu.vector_store %arg10[%c0_29, %c0_30], %39 {strides = array<i32>} : memref<32x1xf32, #tpu.memory_space<vmem>>, vector<32x1xf32>,
      %cst_31 = arith.constant 0.000000e+00 : f32
      %41 = vector.broadcast %cst_31 : f32 to vector<32x1xf32>
      %c0_32 = arith.constant 0 : index
      %c0_33 = arith.constant 0 : index
      %42 = vector.load %arg11[%c0_32, %c0_33] : memref<32x1xf32, #tpu.memory_space<vmem>>, vector<32x1xf32>
      tpu.vector_store %arg11[%c0_32, %c0_33], %41 {strides = array<i32>} : memref<32x1xf32, #tpu.memory_space<vmem>>, vector<32x1xf32>,
    } else {
    }
    %c0 = arith.constant 0 : index
    %c0_1 = arith.constant 0 : index
    %3 = vector.load %arg9[%c0, %c0_1] : memref<32x128xbf16, #tpu.memory_space<vmem>>, vector<32x128xbf16>
    %c0_2 = arith.constant 0 : index
    %c0_3 = arith.constant 0 : index
    %4 = vector.load %arg5[%c0_2, %c0_3] : memref<128x512xbf16, #tpu.memory_space<vmem>>, vector<128x512xbf16>
    %cst = arith.constant dense<0.000000e+00> : vector<32x512xf32>
    %5 = tpu.matmul %3, %4, %cst {dimension_numbers = #tpu.dot_dimension_numbers<[1], [0], [0], [1], [0, 0, 1, 1], [], []>} : vector<32x128xbf16>, vector<128x512xbf16>, vector<32x512xf32> -> vector<32x512xf32>
    %c0_4 = arith.constant 0 : index
    %c0_5 = arith.constant 0 : index
    %6 = vector.load %arg6[%c0_4, %c0_5] : memref<1x512xf32, #tpu.memory_space<vmem>>, vector<1x512xf32>
    %7 = vector.broadcast %6 : vector<1x512xf32> to vector<32x512xf32>
    %8 = arith.addf %5, %7 : vector<32x512xf32>
    %9 = arith.truncf %8 : vector<32x512xf32> to vector<32x512xbf16>
    %c0_6 = arith.constant 0 : index
    %c0_7 = arith.constant 0 : index
    %10 = vector.load %arg7[%c0_6, %c0_7] : memref<32x512xbf16, #tpu.memory_space<vmem>>, vector<32x512xbf16>
    tpu.vector_store %arg7[%c0_6, %c0_7], %9 {strides = array<i32>} : memref<32x512xbf16, #tpu.memory_space<vmem>>, vector<32x512xbf16>,
    %c0_8 = arith.constant 0 : index
    %c0_9 = arith.constant 0 : index
    %11 = vector.load %arg10[%c0_8, %c0_9] : memref<32x1xf32, #tpu.memory_space<vmem>>, vector<32x1xf32>
    %cst_10 = arith.constant dense<0xFF800000> : vector<32xf32>
    %12 = vector.multi_reduction <maximumf>, %8, %cst_10 [1] : vector<32x512xf32> to vector<32xf32>
    %13 = vector.shape_cast %12 : vector<32xf32> to vector<32x1xf32>
    %14 = arith.maximumf %11, %13 : vector<32x1xf32>
    %c0_11 = arith.constant 0 : index
    %c0_12 = arith.constant 0 : index
    %15 = vector.load %arg11[%c0_11, %c0_12] : memref<32x1xf32, #tpu.memory_space<vmem>>, vector<32x1xf32>
    %16 = arith.subf %11, %14 : vector<32x1xf32>
    %17 = math.exp %16 : vector<32x1xf32>
    %18 = arith.mulf %15, %17 : vector<32x1xf32>
    %19 = vector.broadcast %14 : vector<32x1xf32> to vector<32x512xf32>
    %20 = arith.subf %8, %19 : vector<32x512xf32>
    %21 = math.exp %20 : vector<32x512xf32>
    %cst_13 = arith.constant dense<0.000000e+00> : vector<32xf32>
    %22 = vector.multi_reduction <add>, %21, %cst_13 [1] : vector<32x512xf32> to vector<32xf32>
    %23 = vector.shape_cast %22 : vector<32xf32> to vector<32x1xf32>
    %24 = arith.addf %18, %23 : vector<32x1xf32>
    %c0_14 = arith.constant 0 : index
    %c0_15 = arith.constant 0 : index
    %25 = vector.load %arg11[%c0_14, %c0_15] : memref<32x1xf32, #tpu.memory_space<vmem>>, vector<32x1xf32>
    tpu.vector_store %arg11[%c0_14, %c0_15], %24 {strides = array<i32>} : memref<32x1xf32, #tpu.memory_space<vmem>>, vector<32x1xf32>,
    %c0_16 = arith.constant 0 : index
    %c0_17 = arith.constant 0 : index
    %26 = vector.load %arg10[%c0_16, %c0_17] : memref<32x1xf32, #tpu.memory_space<vmem>>, vector<32x1xf32>
    tpu.vector_store %arg10[%c0_16, %c0_17], %14 {strides = array<i32>} : memref<32x1xf32, #tpu.memory_space<vmem>>, vector<32x1xf32>,
    %c1_i32 = arith.constant 1 : i32
    %27 = arith.cmpi eq, %arg1, %c1_i32 : i32
    %28 = arith.extui %27 : i1 to i32
    %c0_i32_18 = arith.constant 0 : i32
    %29 = arith.cmpi ne, %28, %c0_i32_18 : i32
    scf.if %29 {
      %c0_19 = arith.constant 0 : index
      %c0_20 = arith.constant 0 : index
      %30 = vector.load %arg10[%c0_19, %c0_20] : memref<32x1xf32, #tpu.memory_space<vmem>>, vector<32x1xf32>
      %c0_21 = arith.constant 0 : index
      %c0_22 = arith.constant 0 : index
      %31 = vector.load %arg11[%c0_21, %c0_22] : memref<32x1xf32, #tpu.memory_space<vmem>>, vector<32x1xf32>
      %32 = math.log %31 : vector<32x1xf32>
      %33 = arith.addf %30, %32 : vector<32x1xf32>
      %c0_23 = arith.constant 0 : index
      %c0_24 = arith.constant 0 : index
      %34 = vector.load %arg8[%c0_23, %c0_24] : memref<32x1xf32, #tpu.memory_space<vmem>>, vector<32x1xf32>
      tpu.vector_store %arg8[%c0_23, %c0_24], %33 {strides = array<i32>} : memref<32x1xf32, #tpu.memory_space<vmem>>, vector<32x1xf32>,
    } else {
    }
    return
  }
  func.func @transform_0(%arg0: i32, %arg1: i32) -> (i32, i32) {
    %c0_i32 = arith.constant 0 : i32
    %c0_i32_0 = arith.constant 0 : i32
    return %arg0, %c0_i32 : i32, i32
  }
  func.func @transform_1(%arg0: i32, %arg1: i32) -> (i32, i32) {
    %c0_i32 = arith.constant 0 : i32
    %c0_i32_0 = arith.constant 0 : i32
    %c0_i32_1 = arith.constant 0 : i32
    return %c0_i32, %c0_i32_0 : i32, i32
  }
  func.func @transform_2(%arg0: i32, %arg1: i32) -> (i32, i32) {
    %c0_i32 = arith.constant 0 : i32
    %c0_i32_0 = arith.constant 0 : i32
    %c0_i32_1 = arith.constant 0 : i32
    return %c0_i32, %c0_i32_0 : i32, i32
  }
  func.func @transform_3(%arg0: i32, %arg1: i32) -> (i32, i32) {
    %c0_i32 = arith.constant 0 : i32
    %c0_i32_0 = arith.constant 0 : i32
    return %c0_i32, %arg1 : i32, i32
  }
  func.func @transform_4(%arg0: i32, %arg1: i32) -> (i32, i32) {
    %c0_i32 = arith.constant 0 : i32
    %c0_i32_0 = arith.constant 0 : i32
    return %c0_i32, %arg1 : i32, i32
  }
  func.func @transform_5(%arg0: i32, %arg1: i32) -> (i32, i32) {
    %c0_i32 = arith.constant 0 : i32
    return %arg0, %arg1 : i32, i32
  }
  func.func @transform_6(%arg0: i32, %arg1: i32) -> (i32, i32) {
    %c0_i32 = arith.constant 0 : i32
    %c0_i32_0 = arith.constant 0 : i32
    return %arg0, %c0_i32 : i32, i32
  }
}

module attributes {stable_mosaic.version = 11 : i64} {
  func.func @_bengio_kernel(%arg0: i32, %arg1: i32, %arg2: memref<32x128xbf16, #tpu.memory_space<vmem>>, %arg3: memref<128x128xbf16, #tpu.memory_space<vmem>>, %arg4: memref<1x128xf32, #tpu.memory_space<vmem>>, %arg5: memref<128x512xbf16, #tpu.memory_space<vmem>>, %arg6: memref<1x512xf32, #tpu.memory_space<vmem>>, %arg7: memref<32x512xbf16, #tpu.memory_space<vmem>>, %arg8: memref<32x1xf32, #tpu.memory_space<vmem>>, %arg9: memref<32x128xbf16, #tpu.memory_space<vmem>>, %arg10: memref<32x1xf32, #tpu.memory_space<vmem>>, %arg11: memref<32x1xf32, #tpu.memory_space<vmem>>) attributes {dimension_semantics = [#tpu.dimension_semantics<parallel>, #tpu.dimension_semantics<arbitrary>], iteration_bounds = array<i64: 2, 2>, scalar_prefetch = 0 : i64, scratch_operands = 3 : i64, tpu.core_type = #tpu.core_type<tc>, window_params = [{transform_indices = @transform_0, window_bounds = array<i64: 32, 128>}, {pipeline_mode = #tpu.pipeline_mode<synchronous>, transform_indices = @transform_1, window_bounds = array<i64: 128, 128>}, {pipeline_mode = #tpu.pipeline_mode<synchronous>, transform_indices = @transform_2, window_bounds = array<i64: 1, 128>}, {transform_indices = @transform_3, window_bounds = array<i64: 128, 512>}, {transform_indices = @transform_4, window_bounds = array<i64: 1, 512>}, {transform_indices = @transform_5, window_bounds = array<i64: 32, 512>}, {transform_indices = @transform_6, window_bounds = array<i64: 32, 1>}]} {
    %c0_i32 = arith.constant 0 : i32
    %0 = arith.cmpi eq, %arg1, %c0_i32 : i32
    %1 = arith.extui %0 : i1 to i32
    %c0_i32_0 = arith.constant 0 : i32
    %2 = arith.cmpi ne, %1, %c0_i32_0 : i32
    scf.if %2 {
      %c0_19 = arith.constant 0 : index
      %c0_20 = arith.constant 0 : index
      %30 = vector.load %arg2[%c0_19, %c0_20] : memref<32x128xbf16, #tpu.memory_space<vmem>>, vector<32x128xbf16>
      %c0_21 = arith.constant 0 : index
      %c0_22 = arith.constant 0 : index
      %31 = vector.load %arg3[%c0_21, %c0_22] : memref<128x128xbf16, #tpu.memory_space<vmem>>, vector<128x128xbf16>
      %cst_23 = arith.constant dense<0.000000e+00> : vector<32x128xf32>
      %32 = tpu.matmul %30, %31, %cst_23 {dimension_numbers = #tpu.dot_dimension_numbers<[1], [0], [0], [1], [0, 0, 1, 1], [], []>} : vector<32x128xbf16>, vector<128x128xbf16>, vector<32x128xf32> -> vector<32x128xf32>
      %c0_24 = arith.constant 0 : index
      %c0_25 = arith.constant 0 : index
      %33 = vector.load %arg4[%c0_24, %c0_25] : memref<1x128xf32, #tpu.memory_space<vmem>>, vector<1x128xf32>
      %34 = vector.broadcast %33 : vector<1x128xf32> to vector<32x128xf32>
      %35 = arith.addf %32, %34 : vector<32x128xf32>
      %36 = math.tanh %35 : vector<32x128xf32>
      %37 = arith.truncf %36 : vector<32x128xf32> to vector<32x128xbf16>
      %c0_26 = arith.constant 0 : index
      %c0_27 = arith.constant 0 : index
      %38 = vector.load %arg9[%c0_26, %c0_27] : memref<32x128xbf16, #tpu.memory_space<vmem>>, vector<32x128xbf16>
      tpu.vector_store %arg9[%c0_26, %c0_27], %37 {strides = array<i32>} : memref<32x128xbf16, #tpu.memory_space<vmem>>, vector<32x128xbf16>,
      %cst_28 = arith.constant -1.000000e+30 : f32
      %39 = vector.broadcast %cst_28 : f32 to vector<32x1xf32>
      %c0_29 = arith.constant 0 : index
      %c0_30 = arith.constant 0 : index
      %40 = vector.load %arg10[%c0_29, %c0_30] : memref<32x1xf32, #tpu.memory_space<vmem>>, vector<32x1xf32>
      tpu.vector_store %arg10[%c0_29, %c0_30], %39 {strides = array<i32>} : memref<32x1xf32, #tpu.memory_space<vmem>>, vector<32x1xf32>,
      %cst_31 = arith.constant 0.000000e+00 : f32
      %41 = vector.broadcast %cst_31 : f32 to vector<32x1xf32>
      %c0_32 = arith.constant 0 : index
      %c0_33 = arith.constant 0 : index
      %42 = vector.load %arg11[%c0_32, %c0_33] : memref<32x1xf32, #tpu.memory_space<vmem>>, vector<32x1xf32>
      tpu.vector_store %arg11[%c0_32, %c0_33], %41 {strides = array<i32>} : memref<32x1xf32, #tpu.memory_space<vmem>>, vector<32x1xf32>,
    } else {
    }
    %c0 = arith.constant 0 : index
    %c0_1 = arith.constant 0 : index
    %3 = vector.load %arg9[%c0, %c0_1] : memref<32x128xbf16, #tpu.memory_space<vmem>>, vector<32x128xbf16>
    %c0_2 = arith.constant 0 : index
    %c0_3 = arith.constant 0 : index
    %4 = vector.load %arg5[%c0_2, %c0_3] : memref<128x512xbf16, #tpu.memory_space<vmem>>, vector<128x512xbf16>
    %cst = arith.constant dense<0.000000e+00> : vector<32x512xf32>
    %5 = tpu.matmul %3, %4, %cst {dimension_numbers = #tpu.dot_dimension_numbers<[1], [0], [0], [1], [0, 0, 1, 1], [], []>} : vector<32x128xbf16>, vector<128x512xbf16>, vector<32x512xf32> -> vector<32x512xf32>
    %c0_4 = arith.constant 0 : index
    %c0_5 = arith.constant 0 : index
    %6 = vector.load %arg6[%c0_4, %c0_5] : memref<1x512xf32, #tpu.memory_space<vmem>>, vector<1x512xf32>
    %7 = vector.broadcast %6 : vector<1x512xf32> to vector<32x512xf32>
    %8 = arith.addf %5, %7 : vector<32x512xf32>
    %9 = arith.truncf %8 : vector<32x512xf32> to vector<32x512xbf16>
    %c0_6 = arith.constant 0 : index
    %c0_7 = arith.constant 0 : index
    %10 = vector.load %arg7[%c0_6, %c0_7] : memref<32x512xbf16, #tpu.memory_space<vmem>>, vector<32x512xbf16>
    tpu.vector_store %arg7[%c0_6, %c0_7], %9 {strides = array<i32>} : memref<32x512xbf16, #tpu.memory_space<vmem>>, vector<32x512xbf16>,
    %c0_8 = arith.constant 0 : index
    %c0_9 = arith.constant 0 : index
    %11 = vector.load %arg10[%c0_8, %c0_9] : memref<32x1xf32, #tpu.memory_space<vmem>>, vector<32x1xf32>
    %cst_10 = arith.constant dense<0xFF800000> : vector<32xf32>
    %12 = vector.multi_reduction <maximumf>, %8, %cst_10 [1] : vector<32x512xf32> to vector<32xf32>
    %13 = vector.shape_cast %12 : vector<32xf32> to vector<32x1xf32>
    %14 = arith.maximumf %11, %13 : vector<32x1xf32>
    %c0_11 = arith.constant 0 : index
    %c0_12 = arith.constant 0 : index
    %15 = vector.load %arg11[%c0_11, %c0_12] : memref<32x1xf32, #tpu.memory_space<vmem>>, vector<32x1xf32>
    %16 = arith.subf %11, %14 : vector<32x1xf32>
    %17 = math.exp %16 : vector<32x1xf32>
    %18 = arith.mulf %15, %17 : vector<32x1xf32>
    %19 = vector.broadcast %14 : vector<32x1xf32> to vector<32x512xf32>
    %20 = arith.subf %8, %19 : vector<32x512xf32>
    %21 = math.exp %20 : vector<32x512xf32>
    %cst_13 = arith.constant dense<0.000000e+00> : vector<32xf32>
    %22 = vector.multi_reduction <add>, %21, %cst_13 [1] : vector<32x512xf32> to vector<32xf32>
    %23 = vector.shape_cast %22 : vector<32xf32> to vector<32x1xf32>
    %24 = arith.addf %18, %23 : vector<32x1xf32>
    %c0_14 = arith.constant 0 : index
    %c0_15 = arith.constant 0 : index
    %25 = vector.load %arg11[%c0_14, %c0_15] : memref<32x1xf32, #tpu.memory_space<vmem>>, vector<32x1xf32>
    tpu.vector_store %arg11[%c0_14, %c0_15], %24 {strides = array<i32>} : memref<32x1xf32, #tpu.memory_space<vmem>>, vector<32x1xf32>,
    %c0_16 = arith.constant 0 : index
    %c0_17 = arith.constant 0 : index
    %26 = vector.load %arg10[%c0_16, %c0_17] : memref<32x1xf32, #tpu.memory_space<vmem>>, vector<32x1xf32>
    tpu.vector_store %arg10[%c0_16, %c0_17], %14 {strides = array<i32>} : memref<32x1xf32, #tpu.memory_space<vmem>>, vector<32x1xf32>,
    %c1_i32 = arith.constant 1 : i32
    %27 = arith.cmpi eq, %arg1, %c1_i32 : i32
    %28 = arith.extui %27 : i1 to i32
    %c0_i32_18 = arith.constant 0 : i32
    %29 = arith.cmpi ne, %28, %c0_i32_18 : i32
    scf.if %29 {
      %c0_19 = arith.constant 0 : index
      %c0_20 = arith.constant 0 : index
      %30 = vector.load %arg10[%c0_19, %c0_20] : memref<32x1xf32, #tpu.memory_space<vmem>>, vector<32x1xf32>
      %c0_21 = arith.constant 0 : index
      %c0_22 = arith.constant 0 : index
      %31 = vector.load %arg11[%c0_21, %c0_22] : memref<32x1xf32, #tpu.memory_space<vmem>>, vector<32x1xf32>
      %32 = math.log %31 : vector<32x1xf32>
      %33 = arith.addf %30, %32 : vector<32x1xf32>
      %c0_23 = arith.constant 0 : index
      %c0_24 = arith.constant 0 : index
      %34 = vector.load %arg8[%c0_23, %c0_24] : memref<32x1xf32, #tpu.memory_space<vmem>>, vector<32x1xf32>
      tpu.vector_store %arg8[%c0_23, %c0_24], %33 {strides = array<i32>} : memref<32x1xf32, #tpu.memory_space<vmem>>, vector<32x1xf32>,
    } else {
    }
    return
  }
  func.func @transform_0(%arg0: i32, %arg1: i32) -> (i32, i32) {
    %c0_i32 = arith.constant 0 : i32
    %c0_i32_0 = arith.constant 0 : i32
    return %arg0, %c0_i32 : i32, i32
  }
  func.func @transform_1(%arg0: i32, %arg1: i32) -> (i32, i32) {
    %c0_i32 = arith.constant 0 : i32
    %c0_i32_0 = arith.constant 0 : i32
    %c0_i32_1 = arith.constant 0 : i32
    return %c0_i32, %c0_i32_0 : i32, i32
  }
  func.func @transform_2(%arg0: i32, %arg1: i32) -> (i32, i32) {
    %c0_i32 = arith.constant 0 : i32
    %c0_i32_0 = arith.constant 0 : i32
    %c0_i32_1 = arith.constant 0 : i32
    return %c0_i32, %c0_i32_0 : i32, i32
  }
  func.func @transform_3(%arg0: i32, %arg1: i32) -> (i32, i32) {
    %c0_i32 = arith.constant 0 : i32
    %c0_i32_0 = arith.constant 0 : i32
    return %c0_i32, %arg1 : i32, i32
  }
  func.func @transform_4(%arg0: i32, %arg1: i32) -> (i32, i32) {
    %c0_i32 = arith.constant 0 : i32
    %c0_i32_0 = arith.constant 0 : i32
    return %c0_i32, %arg1 : i32, i32
  }
  func.func @transform_5(%arg0: i32, %arg1: i32) -> (i32, i32) {
    %c0_i32 = arith.constant 0 : i32
    return %arg0, %arg1 : i32, i32
  }
  func.func @transform_6(%arg0: i32, %arg1: i32) -> (i32, i32) {
    %c0_i32 = arith.constant 0 : i32
    %c0_i32_0 = arith.constant 0 : i32
    return %arg0, %c0_i32 : i32, i32
  }
}

</mosaic_0001>

<bundles_post_ra>
// kernel: tpu_custom_call.1
= control target key start
LH: loop header
LB: loop body
LE: loop exit
PB: predicated region body
PF: predicated region fallthrough
CT: control target
= control target key end

     0   :  { %s2601_s0 = inlined_call_operand.hbm [shape: bf16[64,128], index: 0, kind: input, shape index: {}]   ;;  %s2602_s1 = inlined_call_operand.hbm [shape: bf16[128,128], index: 1, kind: input, shape index: {}]   ;;  %s2603_s2 = inlined_call_operand.vmem [shape: f32[1,128], index: 2, kind: input, shape index: {}]   ;;  %s2604_s3 = inlined_call_operand.hbm [shape: bf16[128,1024], index: 3, kind: input, shape index: {}]   ;;  %s2605_s4 = inlined_call_operand.hbm [shape: f32[1,1024], index: 4, kind: input, shape index: {}]   ;;  %s2606_s5 = inlined_call_operand.hbm [shape: bf16[64,1024], index: 5, kind: output, shape index: {0}]   ;;  %s2607_s6 = inlined_call_operand.vmem [shape: f32[64,1], index: 6, kind: output, shape index: {1}]  }
   0x1   :  { %2620 = sst [smem:[#allocation24_spill]] %s2601_s0 }
   0x2   :  { %2621 = sst [smem:[#allocation25_spill]] %s2602_s1 }
   0x3   :  { %2622 = sst [smem:[#allocation26_spill]] %s2603_s2 }
   0x4   :  { %2623 = sst [smem:[#allocation27_spill]] %s2604_s3 }
   0x5   :  { %2624 = sst [smem:[#allocation28_spill]] %s2605_s4 }
   0x6   :  { %2625 = sst [smem:[#allocation29_spill]] %s2606_s5 }
   0x7   :  { %2626 = sst [smem:[#allocation30_spill]] %s2607_s6 }
   0x8   :  { %12 = vsyncpa [#allocation6], 0 }
   0x9   :  { %14 = vsyncpa [#allocation6 + $0x1], 0 }
   0xa   :  { %15 = vsyncpa [#allocation9], 0 }
   0xb   :  { %16 = vsyncpa [#allocation7], 0 }
   0xc   :  { %18 = vsyncpa [#allocation7 + $0x1], 0  ;;  %s2057_s21 = smov 0   ;;  %s2059_s22 = smov 0  }
   0xd   :  { %s2061_s23 = smov 0   ;;  %s2063_s24 = smov 0  }
   0xe   :  { %s2065_s25 = smov 0   ;;  %s2067_s26 = smov 0  }
   0xf   :  { %s2069_s27 = smov 0   ;;  %s2071_s28 = smov 0  }
  0x10   :  { %s2073_s29 = smov 0   ;;  %s2075_s30 = smov 0  }
  0x11   :  { %s2077_s7 = smov 0   ;;  %s2079_s8 = smov 0  }
  0x12   :  { %s2081_s9 = smov 0   ;;  %s2083_s10 = smov 0  }
  0x13 LB: > { %2627 = sst [smem:[#allocation17_spill]] %s1952_s21  ;;  %s33_s11 = sadd.s32 1, %s1996_s8  ;;  %s2004_s10 = sphi %s2083_s10, %s24_s10   ;;  %s2000_s9 = sphi %s2081_s9, %s2670_s9   ;;  %s1996_s8 = sphi %s2079_s8, %s2681_s8   ;;  %s1992_s7 = sphi %s2077_s7, %s2668_s7   ;;  %s1988_s30 = sphi %s2075_s30, %s2667_s30   ;;  %s1984_s29 = sphi %s2073_s29, %s2680_s29   ;;  %s1980_s28 = sphi %s2071_s28, %s2679_s28   ;;  %s1976_s27 = sphi %s2069_s27, %s2678_s27   ;;  %s1972_s26 = sphi %s2067_s26, %s2677_s26   ;;  %s1968_s25 = sphi %s2065_s25, %s2676_s25   ;;  %s1964_s24 = sphi %s2063_s24, %s2675_s24   ;;  %s1960_s23 = sphi %s2061_s23, %s2674_s23   ;;  %s1956_s22 = sphi %s2059_s22, %s2673_s22   ;;  %s1952_s21 = sphi %s2057_s21, %s2672_s21  }
  0x14   : > { %2628 = sst [smem:[#allocation18_spill]] %s1988_s30  ;;  %s36_s12 = sadd.s32 1, %s2000_s9 }
  0x15   : > { %2629 = sst [smem:[#allocation19_spill]] %s1992_s7  ;;  %p34_p0 = scmp.ge.s32.totalorder %s33_s11, 2 }
  0x16   : > { %2630 = sst [smem:[#allocation20_spill]] %s1996_s8  ;;  %s43_s13 = sadd.s32 1, %s1984_s29 }
  0x17   : > { %2631 = sst [smem:[#allocation21_spill]] %s2000_s9  ;;  %p50_p1 = scmp.ne.s32.totalorder %s1984_s29, %s1980_s28 }
  0x18   : > { %p51_p2 = scmp.eq.s32.totalorder %s2004_s10, 0  ;;  %s2683_s11 = smov (%p34_p0, %s33_s11), 0 }
  0x19   : > { %2632 = sst [smem:[#allocation22_spill]] %s2683_s11  ;;  %s2685_s12 = smov (!%p34_p0, %s36_s12), %s2000_s9 }
  0x1a   : > { %p2138_p3 = por %p51_p2, %p50_p1  ;;  %s2144_s15 = ssub.s32 %s1996_s8, %s2683_s11 }
  0x1b   : > { %p38_p4 = scmp.ge.s32.totalorder %s2685_s12, 2  ;;  %p109_p5 = scmp.eq.s32.totalorder %s2144_s15, 0 }
  0x1c   : > { %s165_s16 = sadd.s32 1, %s1960_s23  ;;  %p1497_p6 = scmp.lt.s32.totalorder %s2004_s10, 4 }
  0x1d   : > { %s2687_s12 = smov (%p38_p4, %s2685_s12), 0  ;;  %s244_s19 = sand.u32 1, %s2004_s10  }
  0x1e   : > { %2634 = sst [smem:[#allocation23_spill]] %s2687_s12  ;;  %s40_s17 = ssub.s32 %s2000_s9, %s2687_s12 }
  0x1f   : > { %p41_p7 = scmp.eq.s32.totalorder %s40_s17, 0  ;;  %s162_s18 = sor.u32 %s2144_s15, %s40_s17 }
  0x20   : > { %p163_p8 = scmp.eq.s32.totalorder %s162_s18, 0  ;;  %s246_s5 = sand.u32 1, %s1984_s29  }
  0x21   : > { %s2156_s20 = scalar_select %p41_p7, %s1984_s29, %s43_s13  }
  0x22   : > { %s2159_s11 = scalar_select %p163_p8, %s1960_s23, %s165_s16  }
  0x23   : > { %s1326_s2 = sshll.u32 %s246_s5, 4  ;;  %s1409_s30 = sshll.u32 %s2000_s9, 8 }
  0x24   : > { %s2635_s0 = sld [smem:[#allocation24_spill]]  ;;  %s248_s4 = scalar_lea.vmem [#allocation5], %s1326_s2 }
  0x25   : > { %s255_s21 = sshll.u32 %s248_s4, 4  ;;  %p2170_p9 = pnand %p1497_p6, %p2138_p3  ;;  %s256_s21 = int_to_ptr.vmem [resolvable:$true] %s255_s21 }
  0x26   : > { %s2174_s13 = scalar_lea.sflag [#allocation6], %s244_s19  ;;  %s1755_s5 = scalar_lea.vmem %s256_s21, 256 }
  0x27   : > { %p1744_p10 = pneg %p2170_p9  ;;  %p1756_p11 = scmp.ne.s32.totalorder %s256_s21, %s1755_s5 }
  0x28   : > { %s2006_s6 = smov [#allocation5]  }
  0x29   : > { %p1758_p12 = pnand %p1756_p11, %p1744_p10 }
  0x2a   : > { %s254_s1 = scalar_lea.hbm %s2635_s0, %s1409_s30  ;;  %s1760_s30 = sshll.u32 %s2006_s6, 4  ;;  %s1761_s30 = int_to_ptr.vmem [resolvable:$false] %s1760_s30 }
  0x2b   : > { %p1759_p13 = pneg %p1758_p12  ;;  %s1762_s2 = scalar_lea.vmem %s1761_s30, 512 }
  0x2c   : > { %p1763_p0 = scmp.lt.s32.totalorder %s256_s21, %s1761_s30  ;;  %p1764_p1 = scmp.lt.s32.totalorder %s1762_s2, %s1755_s5 }
  0x2e   : > { %p1765_p3 = por %p1764_p1, %p1763_p0 }
  0x30   : > { %p1766_p4 = pnand %p1765_p3, %p1759_p13 }
  0x32   : > { %1769 = shalt.err (!%p1766_p4)
}
  0x33   : > { %s2612_s4 = smov 64   ;;  %s2613_s7 = smov 4  }
  0x34   : > { %1485 = dma.hbm_to_vmem [thread:$0]  (!%p2170_p9), %s254_s1, 256, %s256_s21, %s2174_s13, %s2612_s4, %s2612_s4, %s2613_s7  }
  0x35   : > { %s111_s14 = sadd.s32 1, %s1972_s26  ;;  %p118_p7 = scmp.ne.s32.totalorder %s1972_s26, %s1968_s25 }
  0x36   : > { %s2190_s16 = scalar_select %p109_p5, %s1972_s26, %s111_s14  }
  0x37   : > { %p120_p8 = por %p118_p7, %p51_p2  ;;  %s267_s17 = sand.u32 1, %s1972_s26  }
  0x38   : > { %s1329_s18 = sshll.u32 %s267_s17, 8  ;;  %s1410_s19 = sshll.u32 %s1996_s8, 8 }
  0x39   : > { %s2637_s3 = sld [smem:[#allocation27_spill]]  ;;  %s269_s12 = scalar_lea.vmem [#allocation10], %s1329_s18 }
  0x3a   : > { %s276_s2 = sshll.u32 %s269_s12, 4  ;;  %p2203_p10 = pnand %p1497_p6, %p120_p8  ;;  %s277_s2 = int_to_ptr.vmem [resolvable:$true] %s276_s2 }
  0x3b   : > { %s1783_s21 = scalar_lea.vmem %s277_s2, 4096  ;;  %s2009_s15 = smov [#allocation10]  }
  0x3c   : > { %p2611_p2 = pneg %p2203_p10  ;;  %p1784_p5 = scmp.ne.s32.totalorder %s277_s2, %s1783_s21 }
  0x3d   : > { %s1788_s14 = sshll.u32 %s2009_s15, 4  ;;  %s1789_s14 = int_to_ptr.vmem [resolvable:$false] %s1788_s14 }
  0x3e   : > { %p1786_p9 = pnand %p1784_p5, %p2611_p2  ;;  %s1790_s18 = scalar_lea.vmem %s1789_s14, 8192 }
  0x3f   : > { %s275_s30 = scalar_lea.hbm %s2637_s3, %s1410_s19  ;;  %p1791_p12 = scmp.lt.s32.totalorder %s277_s2, %s1789_s14 }
  0x40   : > { %p1787_p11 = pneg %p1786_p9  ;;  %p1792_p6 = scmp.lt.s32.totalorder %s1790_s18, %s1783_s21 }
  0x42   : > { %p1793_p13 = por %p1792_p6, %p1791_p12 }
  0x44   : > { %p1794_p0 = pnand %p1793_p13, %p1787_p11 }
  0x46   : > { %1797 = shalt.err (!%p1794_p0)
}
  0x47   : > { %s2010_s19 = smov 512   ;;  %s2639_s5 = sld [smem:[#allocation17_spill]] }
  0x48   : > { %s2011_s6 = smov 256   ;;  %s2012_s12 = smov 16  }
  0x49   : > { %1488 = dma.hbm_to_vmem [thread:$0]  (!%p2203_p10), %s275_s30, 4096, %s277_s2, %s2174_s13, %s2010_s19, %s2011_s6, %s2012_s12  }
  0x4a   : > { %s2216_s21 = sadd.s32 4294967295, %s2004_s10   ;;  %s1322_s15 = sadd.s32 4294967294, %s2004_s10  }
  0x4b   : > { %p56_p1 = scmp.ne.s32.totalorder %s1980_s28, %s1976_s27  ;;  %p2618_p3 = scmp.eq.s32.totalorder %s2216_s21, 0 }
  0x4c   : > { %p124_p4 = scmp.ne.s32.totalorder %s1968_s25, %s1964_s24  ;;  %p175_p7 = scmp.ne.s32.totalorder %s1960_s23, %s1956_s22 }
  0x4d   : > { %p176_p8 = scmp.eq.s32.totalorder %s2216_s21, 3  ;;  %p2229_p5 = por %p2618_p3, %p56_p1 }
  0x4e   : > { %p2235_p9 = por %p124_p4, %p2618_p3  ;;  %p181_p12 = scmp.ne.s32.totalorder %s1956_s22, %s2639_s5 }
  0x4f   : > { %s2640_s14 = scalar_select %p2229_p5, 1, 0 }
  0x50   : > { %s2641_s30 = scalar_select %p2235_p9, 1, 0 }
  0x51   : > { %p2239_p11 = por %p176_p8, %p175_p7  ;;  %p182_p6 = scmp.eq.s32.totalorder %s1322_s15, 3 }
  0x52   : > { %p1323_p13 = scmp.ge.s32.totalorder %s2004_s10, 1  ;;  %p215_p0 = scmp.lt.s32.totalorder %s2004_s10, 5 }
  0x53   : > { %s2642_s2 = scalar_select %p2239_p11, 1, 0 }
  0x54   : > { %p2247_p2 = por %p182_p6, %p181_p12  ;;  %p2251_p1 = pnand %p1323_p13, %p215_p0 }
  0x55   : > { %s2013_s18 = smov [#allocation8]   ;;  %s1332_s6 = sshll.u32 %s267_s17, 2 }
  0x56   : > { %s2643_s24 = scalar_select %p2247_p2, 1, 0 }
  0x57   : > { %s227_s19 = sshll.u32 %s2013_s18, 4  ;;  %p1478_p4 = pneg %p2251_p1  ;;  %s228_s19 = int_to_ptr.vmem [resolvable:$true] %s227_s19 }
  0x58   : > { %s1411_s12 = sshll.u32 %s1996_s8, 6  ;;  %s290_s5 = scalar_lea.vmem [#allocation11], %s1332_s6 }
  0x59   : > { %s298_s15 = sshll.u32 %s290_s5, 4  ;;  %p1479_p7 = pnand %p1478_p4, %p2618_p3  ;;  %s299_s15 = int_to_ptr.vmem [resolvable:$true] %s298_s15 }
  0x5a   : > { %s2645_s0 = sld [smem:[#allocation28_spill]]  ;;  %s1809_s9 = scalar_lea.vmem %s228_s19, 1024 }
  0x5b   : > { %p1800_p8 = pneg %p1479_p7  ;;  %p1810_p12 = scmp.ne.s32.totalorder %s228_s19, %s1809_s9 }
  0x5c   : > { %p1817_p0 = scmp.lt.s32.totalorder %s228_s19, %s228_s19  ;;  %p1818_p2 = scmp.lt.s32.totalorder %s1809_s9, %s1809_s9 }
  0x5d   : > { %p1812_p6 = pnand %p1810_p12, %p1800_p8 }
  0x5e   : > { %p1819_p11 = por %p1818_p2, %p1817_p0 }
  0x5f   : > { %p1813_p13 = pneg %p1812_p6 }
  0x60   : > { %s296_s3 = scalar_lea.hbm %s2645_s0, %s1411_s12 }
  0x61   : > { %p1820_p9 = pnand %p1819_p11, %p1813_p13 }
  0x63   : > { %1823 = shalt.err (!%p1820_p9)
}
  0x64   : > { %s2646_s17 = smov 4   ;;  %s2647_s18 = smov 64  }
  0x65   : > { %s2648_s8 = sld [smem:[#allocation25_spill]]  ;;  %s1837_s0 = scalar_lea.vmem %s299_s15, 64 }
  0x66   : > { %p1838_p4 = scmp.ne.s32.totalorder %s299_s15, %s1837_s0  ;;  %p2649_p3 = pneg %p2203_p10 }
  0x67   : > { %s2014_s4 = smov [#allocation11]  }
  0x68   : > { %p1840_p5 = pnand %p1838_p4, %p2649_p3  ;;  %s1842_s7 = sshll.u32 %s2014_s4, 4  ;;  %s1843_s7 = int_to_ptr.vmem [resolvable:$false] %s1842_s7 }
  0x69   : > { %s1844_s9 = scalar_lea.vmem %s1843_s7, 128  ;;  %p1845_p2 = scmp.lt.s32.totalorder %s299_s15, %s1843_s7 }
  0x6a   : > { %p1841_p8 = pneg %p1840_p5  ;;  %p1846_p9 = scmp.lt.s32.totalorder %s1844_s9, %s1837_s0 }
  0x6b   : > { %1481 = dma.hbm_to_vmem [thread:$0]  (!%p1479_p7), %s2648_s8, 1024, %s228_s19, [#allocation9], %s2647_s18, %s2647_s18, %s2646_s17  }
  0x6c   : > { %p1847_p11 = por %p1846_p9, %p1845_p2 }
  0x6e   : > { %p1848_p12 = pnand %p1847_p11, %p1841_p8 }
  0x70   : > { %1851 = shalt.err (!%p1848_p12)
}
  0x71   : > { %1491 = dma.hbm_to_vmem [thread:$0]  (!%p2203_p10), %s296_s3, 64, %s299_s15, %s2174_s13  }
  0x72   : > { %307 = sbr.rel (%p2251_p1) target bundleno = 1131 (0x46b), region = 40  ;;  %s309_s8 = sand.u32 (!%p2251_p1), 1, %s2216_s21  }
  0x73   : > { %s311_s19 = sand.u32 (!%p2251_p1), 1, %s1980_s28   ;;  %s310_s17 = scalar_lea.sflag (!%p2251_p1), [#allocation6], %s309_s8 }
  0x74   : > { %s2281_s12 = sshll.u32 (!%p2251_p1), %s311_s19, 4  ;;  %p2650_p3 = scmp.ne.s32.totalorder (!%p2251_p1), %s2640_s14, 0 }
  0x75   : > { %s313_s18 = scalar_lea.vmem (!%p2251_p1), [#allocation5], %s2281_s12 }
  0x77   : > { %1935 = dma.done.wait (%p2650_p3), %s310_s17, 256  }
  0x78   : > { %1937 = vsyncadd (%p2650_p3), %s310_s17, 4294967040  ;;  %p2651_p10 = scmp.eq.s32.totalorder %s2216_s21, 0 }
  0x7a   : > { %1939 = dma.done.wait (%p2651_p10), [#allocation9], 1024   ;;  %p2652_p5 = pmov %p2651_p10 }
  0x7b   : > { %s324_s3 = sand.u32 1, %s1968_s25   ;;  %p2653_p1 = scmp.ne.s32.totalorder %s2641_s30, 0 }
  0x7c   : > { %1941 = vsyncadd (%p2652_p5), [#allocation9], 4294966272  ;;  %s1338_s13 = sshll.u32 %s324_s3, 8 }
  0x7d   : > { %s2293_s1 = scalar_lea.vmem [#allocation10], %s1338_s13 }
  0x7e   : > { %1943 = dma.done.wait (%p2653_p1), %s310_s17, 4160  }
  0x7f   : > { %1945 = vsyncadd (%p2653_p1), %s310_s17, 4294963136  ;;  %s2654_s14 = sld [smem:[#allocation19_spill]]  ;;  %s2299_s27 = sshll.u32 %s324_s3, 2 }
  0x80   : > { %s369_s15 = sand.u32 1, %s1956_s22   ;;  %s2655_s7 = sld [smem:[#allocation30_spill]] }
  0x81   : > { %s1340_s21 = sshll.u32 %s369_s15, 6  ;;  %s335_s30 = scalar_lea.vmem [#allocation11], %s2299_s27 }
  0x82   : > { %s2311_s8 = scalar_lea.vmem [#allocation12], %s1340_s21  ;;  %s2656_s19 = sld [smem:[#allocation18_spill]] }
  0x85   : > { %s1341_s6 = sshll.u32 %s2654_s14, 2 }
  0x86   : > { %p385_p7 = scmp.lt.s32.totalorder %s1341_s6, 7 }
  0x88   : > { %s2689_s6 = smov (!%p385_p7, %s1341_s6), 7  ;;  %p1343_p6 = scmp.ne.s32.totalorder %s2656_s19, 0 }
  0x89   : > { %s1342_s5 = sshll.u32 %s2689_s6, 3  ;;  %s2657_s13 = sld [smem:[#allocation26_spill]] (!%p1343_p6) }
  0x8a   : > { %s2308_s9 = scalar_lea.vmem %s2655_s7, %s1342_s5  ;;  %394 = sbr.rel (%p1343_p6) target bundleno = 394 (0x18a), region = 60 }
  0x8f   : > { %v1624_v0 = vld [vmem:[#allocation8 + $0x38] sm:$0xff]   ;;  %v1625_v1 = vld [vmem:[#allocation8 + $0x30] sm:$0xff]   ;;  %v1626_v2 = vld [vmem:[#allocation8 + $0x28] sm:$0xff]   ;;  %vm555_vm0 = vcmask 7168   ;;  %v2015_v10 = vmov -1e+30  }
  0x90   : > { %1446 = vmatprep.subr.bf16.mxu0 %v1624_v0  ;;  %v1627_v3 = vld [vmem:[#allocation8 + $0x20] sm:$0xff]   ;;  %v1628_v5 = vld [vmem:[#allocation8 + $0x18] sm:$0xff]   ;;  %v1629_v6 = vld [vmem:[#allocation8 + $0x10] sm:$0xff]   ;;  %556 = vst.msk [vmem:[#allocation3] sm:$0xff] %vm555_vm0, %v2015_v10  ;;  %v2016_v11 = vmov 0.0  }
  0x91   : > { %1447 = vmatpush3.bf16.msra.mxu0 %v1624_v0  ;;  %v1632_v4 = vld [vmem:[%s313_s18] sm:$0xff]   ;;  %v1630_v7 = vld [vmem:[#allocation8 + $0x8] sm:$0xff]   ;;  %557 = vst.msk [vmem:[#allocation3 + $0x8] sm:$0xff] %vm555_vm0, %v2015_v10  ;;  %558 = vst.msk [vmem:[#allocation3 + $0x10] sm:$0xff] %vm555_vm0, %v2015_v10 }
  0x92   : > { %1448 = vmatprep.subr.bf16.mxu0 %v1625_v1  ;;  %1462 = vmatprep.mubr.bf16.mxu0 %v1632_v4  ;;  %v1631_v8 = vld [vmem:[#allocation8] sm:$0xff]   ;;  %v1633_v9 = vld [vmem:[%s313_s18 + $0x8] sm:$0xff]   ;;  %559 = vst.msk [vmem:[#allocation3 + $0x18] sm:$0xff] %vm555_vm0, %v2015_v10  ;;  %560 = vst.msk [vmem:[#allocation4] sm:$0xff] %vm555_vm0, %v2016_v11 }
  0x93   : > { %561 = vst.msk [vmem:[#allocation4 + $0x8] sm:$0xff] %vm555_vm0, %v2016_v11  ;;  %562 = vst.msk [vmem:[#allocation4 + $0x10] sm:$0xff] %vm555_vm0, %v2016_v11  ;;  %v1344_v12 = vld [vmem:[%s2657_s13] ss:$0 sm:$0xff] }
  0x94   : > { %563 = vst.msk [vmem:[#allocation4 + $0x18] sm:$0xff] %vm555_vm0, %v2016_v11 }
  0x95   : > { %1449 = vmatpush3.bf16.msra.mxu0 %v1625_v1 }
  0x96   : > { %1450 = vmatprep.subr.bf16.mxu0 %v1626_v2 }
  0x99   : > { %1451 = vmatpush3.bf16.msra.mxu0 %v1626_v2 }
  0x9a   : > { %1452 = vmatprep.subr.bf16.mxu0 %v1627_v3 }
  0x9d   : > { %1453 = vmatpush3.bf16.msra.mxu0 %v1627_v3 }
  0x9e   : > { %1454 = vmatprep.subr.bf16.mxu0 %v1628_v5 }
  0xa1   : > { %1455 = vmatpush3.bf16.msra.mxu0 %v1628_v5 }
  0xa2   : > { %1456 = vmatprep.subr.bf16.mxu0 %v1629_v6 }
  0xa5   : > { %1457 = vmatpush3.bf16.msra.mxu0 %v1629_v6 }
  0xa6   : > { %1458 = vmatprep.subr.bf16.mxu0 %v1630_v7 }
  0xa9   : > { %1459 = vmatpush3.bf16.msra.mxu0 %v1630_v7 }
  0xaa   : > { %1460 = vmatprep.subr.bf16.mxu0 %v1631_v8 }
  0xad   : > { %1461 = vmatpush3.bf16.msra.mxu0 %v1631_v8 }
  0xb0   : > { %1463 = vmatmul.mubr.bf16.vlgmr.msra.gmra.mxu0 %v1633_v9 }
 0x170   : > { %v1464_v13 = vpop.f32.mrf.mxu0 }
 0x171   : > { %v525_v14 = vadd.f32 %v1464_v13, %v1344_v12 }
 0x172   : > { %v516_v15 = vpop.f32.mrf.mxu0 }
 0x173   : > { %v517_v16 = vadd.f32 %v1344_v12, %v516_v15  ;;  %1634 = vtanh.f32 %v525_v14 }
 0x174   : > { %v1465_v17 = vpop.f32.mrf.mxu0 }
 0x175   : > { %v528_v18 = vadd.f32 %v1465_v17, %v1344_v12 }
 0x176   : > { %v519_v19 = vpop.f32.mrf.mxu0 }
 0x177   : > { %1636 = vtanh.f32 %v528_v18  ;;  %v520_v20 = vadd.f32 %v1344_v12, %v519_v19 }
 0x178   : > { %1638 = vtanh.f32 %v517_v16 }
 0x179   : > { %1640 = vtanh.f32 %v520_v20 }
 0x180   : > { %v1635_v21 = vpop.eup %1634 }
 0x184   : > { %v1637_v22 = vpop.eup %1636 }
 0x185   : > { %v1639_v23 = vpop.eup %1638  ;;  %v1433_v24 = vpack.c.bf16 %v1637_v22, %v1635_v21 }
 0x186   : > { %v1641_v25 = vpop.eup %1640 }
 0x187   : > { %1435 = vst [vmem:[#allocation2 + $0x8] sm:$0xff] %v1433_v24   ;;  %v1428_v26 = vpack.c.bf16 %v1641_v25, %v1639_v23 }
 0x189   : > { %1429 = vst [vmem:[#allocation2] sm:$0xff] %v1428_v26  }
 0x18a PF: > { %v1644_v27 = vld [vmem:[%s2293_s1 + $0xe4] ss:$16 sps:$4 sm:$0xff]   ;;  %v1646_v28 = vld [vmem:[%s2293_s1 + $0xec] ss:$16 sps:$4 sm:$0xff]   ;;  %v2017_v29 = vmov 0   ;;  %v602_v62 = vlaneseq  ;;  %vm1096_vm1 = vcmask 7168  }
 0x18b   : > { %826 = vmatprep.mubr.bf16.mxu0 %v2017_v29  ;;  %879 = vmatprep.mubr.bf16.mxu1 %v2017_v29  ;;  %v1648_v30 = vld [vmem:[%s2293_s1 + $0xe0] ss:$16 sps:$4 sm:$0xff]   ;;  %v1649_v31 = vld [vmem:[%s2293_s1 + $0xe8] ss:$16 sps:$4 sm:$0xff]   ;;  %v1650_v32 = vld [vmem:[%s2293_s1 + $0xc4] ss:$16 sps:$4 sm:$0xff]  }
 0x18c   : > { %794 = vmatprep.subr.bf16.mxu0 %v1644_v27  ;;  %1642 = vset.pattern.permute.xlu0 %v2017_v29  ;;  %v1652_v33 = vld [vmem:[%s2293_s1 + $0xcc] ss:$16 sps:$4 sm:$0xff]   ;;  %v1654_v34 = vld [vmem:[%s2293_s1 + $0xc0] ss:$16 sps:$4 sm:$0xff]   ;;  %v1655_v35 = vld [vmem:[%s2293_s1 + $0xc8] ss:$16 sps:$4 sm:$0xff]  }
 0x18d   : > { %847 = vmatprep.subr.bf16.mxu1 %v1646_v28  ;;  %1643 = vset.pattern.permute.xlu1 %v2017_v29  ;;  %v1656_v36 = vld [vmem:[%s2293_s1 + $0xa4] ss:$16 sps:$4 sm:$0xff]   ;;  %v1658_v37 = vld [vmem:[%s2293_s1 + $0xac] ss:$16 sps:$4 sm:$0xff]   ;;  %v1660_v38 = vld [vmem:[%s2293_s1 + $0xa0] ss:$16 sps:$4 sm:$0xff]  }
 0x18e   : > { %795 = vmatpush1.bf16.msra.mxu0 %v1648_v30  ;;  %848 = vmatpush1.bf16.msra.mxu1 %v1649_v31  ;;  %v1661_v39 = vld [vmem:[%s2293_s1 + $0xa8] ss:$16 sps:$4 sm:$0xff]   ;;  %v1662_v40 = vld [vmem:[%s2293_s1 + $0x84] ss:$16 sps:$4 sm:$0xff]   ;;  %v1664_v41 = vld [vmem:[%s2293_s1 + $0x8c] ss:$16 sps:$4 sm:$0xff]  }
 0x18f   : > { %796 = vmatprep.subr.bf16.mxu0 %v1650_v32  ;;  %849 = vmatprep.subr.bf16.mxu1 %v1652_v33  ;;  %v1666_v42 = vld [vmem:[%s2293_s1 + $0x80] ss:$16 sps:$4 sm:$0xff]   ;;  %v1667_v43 = vld [vmem:[%s2293_s1 + $0x88] ss:$16 sps:$4 sm:$0xff]   ;;  %v1668_v44 = vld [vmem:[%s2293_s1 + $0x64] ss:$16 sps:$4 sm:$0xff]  }
 0x190   : > { %v1670_v45 = vld [vmem:[%s2293_s1 + $0x6c] ss:$16 sps:$4 sm:$0xff]   ;;  %v1672_v46 = vld [vmem:[%s2293_s1 + $0x60] ss:$16 sps:$4 sm:$0xff]   ;;  %v1673_v47 = vld [vmem:[%s2293_s1 + $0x68] ss:$16 sps:$4 sm:$0xff]  }
 0x191   : > { %v1674_v48 = vld [vmem:[%s2293_s1 + $0x44] ss:$16 sps:$4 sm:$0xff]   ;;  %v1676_v49 = vld [vmem:[%s2293_s1 + $0x4c] ss:$16 sps:$4 sm:$0xff]   ;;  %v1678_v50 = vld [vmem:[%s2293_s1 + $0x40] ss:$16 sps:$4 sm:$0xff]  }
 0x192   : > { %797 = vmatpush1.bf16.msra.mxu0 %v1654_v34  ;;  %850 = vmatpush1.bf16.msra.mxu1 %v1655_v35  ;;  %v1679_v51 = vld [vmem:[%s2293_s1 + $0x48] ss:$16 sps:$4 sm:$0xff]   ;;  %v1680_v52 = vld [vmem:[%s2293_s1 + $0x24] ss:$16 sps:$4 sm:$0xff]   ;;  %v1682_v53 = vld [vmem:[%s2293_s1 + $0x2c] ss:$16 sps:$4 sm:$0xff]  }
 0x193   : > { %798 = vmatprep.subr.bf16.mxu0 %v1656_v36  ;;  %851 = vmatprep.subr.bf16.mxu1 %v1658_v37  ;;  %v1684_v54 = vld [vmem:[%s2293_s1 + $0x20] ss:$16 sps:$4 sm:$0xff]   ;;  %v1685_v55 = vld [vmem:[%s2293_s1 + $0x28] ss:$16 sps:$4 sm:$0xff]   ;;  %v1686_v56 = vld [vmem:[%s2293_s1 + $0x4] ss:$16 sps:$4 sm:$0xff]  }
 0x194   : > { %v1688_v57 = vld [vmem:[%s2293_s1 + $0xc] ss:$16 sps:$4 sm:$0xff]   ;;  %v1690_v58 = vld [vmem:[%s2293_s1] ss:$16 sps:$4 sm:$0xff]   ;;  %v1691_v59 = vld [vmem:[%s2293_s1 + $0x8] ss:$16 sps:$4 sm:$0xff]  }
 0x195   : > { %v1692_v60 = vld [vmem:[#allocation2] sm:$0xff]   ;;  %v1693_v61 = vld [vmem:[#allocation2 + $0x8] sm:$0xff]   ;;  %v603_v63 = vshrl.u32 %v602_v62, 7  ;;  %v600_v4 = vld [vmem:[%s335_s30] sm:$0xf]  ;;  %s2658_s12 = sld [smem:[#allocation18_spill]] }
 0x196   : > { %799 = vmatpush1.bf16.msra.mxu0 %v1660_v38  ;;  %852 = vmatpush1.bf16.msra.mxu1 %v1661_v39 }
 0x197   : > { %800 = vmatprep.subr.bf16.mxu0 %v1662_v40  ;;  %853 = vmatprep.subr.bf16.mxu1 %v1664_v41  ;;  %v612_v0 = vsub.s32 2, %v603_v63  ;;  %v604_v1 = vsub.s32 0, %v603_v63  ;;  %v608_v2 = vsub.s32 1, %v603_v63  ;;  %v616_v3 = vsub.s32 3, %v603_v63 }
 0x199   : > { %v613_v5 = vrot.slane %v600_v4, %v612_v0  ;;  %v605_v6 = vrot.slane %v600_v4, %v604_v1  ;;  %v609_v7 = vrot.slane %v600_v4, %v608_v2  ;;  %v617_v8 = vrot.slane %v600_v4, %v616_v3  ;;  %v2438_v0 = vld [vmem:[#allocation3 + $0x8] sm:$0xff]  ;;  %v2448_v4 = vld [vmem:[#allocation3 + $0x10] sm:$0xff] }
 0x19a   : > { %801 = vmatpush1.bf16.msra.mxu0 %v1666_v42  ;;  %854 = vmatpush1.bf16.msra.mxu1 %v1667_v43 }
 0x19b   : > { %802 = vmatprep.subr.bf16.mxu0 %v1668_v44  ;;  %855 = vmatprep.subr.bf16.mxu1 %v1670_v45  ;;  %p1401_p13 = scmp.ne.s32.totalorder %s2658_s12, 1 }
 0x19e   : > { %803 = vmatpush1.bf16.msra.mxu0 %v1672_v46  ;;  %856 = vmatpush1.bf16.msra.mxu1 %v1673_v47 }
 0x19f   : > { %804 = vmatprep.subr.bf16.mxu0 %v1674_v48  ;;  %857 = vmatprep.subr.bf16.mxu1 %v1676_v49 }
 0x1a2   : > { %805 = vmatpush1.bf16.msra.mxu0 %v1678_v50  ;;  %858 = vmatpush1.bf16.msra.mxu1 %v1679_v51 }
 0x1a3   : > { %806 = vmatprep.subr.bf16.mxu0 %v1680_v52  ;;  %859 = vmatprep.subr.bf16.mxu1 %v1682_v53 }
 0x1a6   : > { %807 = vmatpush1.bf16.msra.mxu0 %v1684_v54  ;;  %860 = vmatpush1.bf16.msra.mxu1 %v1685_v55 }
 0x1a7   : > { %808 = vmatprep.subr.bf16.mxu0 %v1686_v56  ;;  %861 = vmatprep.subr.bf16.mxu1 %v1688_v57 }
 0x1aa   : > { %809 = vmatpush1.bf16.msra.mxu0 %v1690_v58  ;;  %862 = vmatpush1.bf16.msra.mxu1 %v1691_v59 }
 0x1ad   : > { %827 = vmatmul.mubr.bf16.vlgmr.msra.gmra.mxu0 %v1692_v60  ;;  %880 = vmatmul.mubr.bf16.vlgmr.msra.gmra.mxu1 %v1692_v60 }
 0x1ae   : > { %836 = vmatprep.mubr.bf16.mxu0 %v2017_v29  ;;  %889 = vmatprep.mubr.bf16.mxu1 %v2017_v29 }
 0x1b5   : > { %837 = vmatmul.mubr.bf16.gmra.mxu0 %v1693_v61  ;;  %890 = vmatmul.mubr.bf16.gmra.mxu1 %v1693_v61  ;;  %v2433_v61 = vld [vmem:[#allocation3] sm:$0xff] }
 0x26d   : > { %v828_v9 = vpop.f32.mrf.mxu0  ;;  %v881_v10 = vpop.f32.mrf.mxu1 }
 0x26e   : > { %v2361_v11 = vadd.f32 %v881_v10, %v613_v5  ;;  %v2363_v14 = vadd.f32 %v828_v9, %v605_v6 }
 0x26f   : > { %v830_v12 = vpop.f32.mrf.mxu0  ;;  %v883_v13 = vpop.f32.mrf.mxu1 }
 0x270   : > { %v2365_v15 = vadd.f32 %v830_v12, %v609_v7  ;;  %v2367_v16 = vadd.f32 %v883_v13, %v617_v8 }
 0x271   : > { %v832_v17 = vpop.f32.mrf.mxu0  ;;  %v885_v18 = vpop.f32.mrf.mxu1 }
 0x272   : > { %v1416_v19 = vpack.c.bf16 %v2365_v15, %v2363_v14  ;;  %v1417_v20 = vpack.c.bf16 %v2367_v16, %v2361_v11  ;;  %v960_v23 = vmax.f32 %v2363_v14, %v2365_v15  ;;  %v2377_v24 = vadd.f32 %v832_v17, %v605_v6 }
 0x273   : > { %v834_v21 = vpop.f32.mrf.mxu0  ;;  %v887_v22 = vpop.f32.mrf.mxu1  ;;  %v2379_v25 = vadd.f32 %v885_v18, %v613_v5 }
 0x274   : > { %948 = vst [vmem:[%s2311_s8] sm:$0xff] %v1416_v19  ;;  %949 = vst [vmem:[%s2311_s8 + $0x8] sm:$0xff] %v1417_v20  ;;  %v2381_v26 = vadd.f32 %v834_v21, %v609_v7  ;;  %v2383_v27 = vadd.f32 %v887_v22, %v617_v8  ;;  %v961_v30 = vmax.f32 %v960_v23, %v2361_v11 }
 0x275   : > { %v838_v28 = vpop.f32.mrf.mxu0  ;;  %v891_v29 = vpop.f32.mrf.mxu1 }
 0x276   : > { %v1418_v31 = vpack.c.bf16 %v2381_v26, %v2377_v24  ;;  %v965_v32 = vmax.f32 %v2377_v24, %v2381_v26  ;;  %v1419_v33 = vpack.c.bf16 %v2383_v27, %v2379_v25  ;;  %v2392_v34 = vadd.f32 %v891_v29, %v613_v5 }
 0x277   : > { %v840_v35 = vpop.f32.mrf.mxu0  ;;  %v893_v36 = vpop.f32.mrf.mxu1  ;;  %v962_v37 = vmax.f32 %v961_v30, %v2367_v16  ;;  %v2397_v38 = vadd.f32 %v838_v28, %v605_v6 }
 0x278   : > { %950 = vst [vmem:[%s2311_s8 + $0x10] sm:$0xff] %v1418_v31  ;;  %951 = vst [vmem:[%s2311_s8 + $0x18] sm:$0xff] %v1419_v33  ;;  %v2399_v39 = vadd.f32 %v840_v35, %v609_v7  ;;  %v2401_v40 = vadd.f32 %v893_v36, %v617_v8  ;;  %v966_v41 = vmax.f32 %v965_v32, %v2379_v25 }
 0x279   : > { %963 = vmax.xlane.f32.xlu0 %v962_v37  ;;  %v842_v42 = vpop.f32.mrf.mxu0  ;;  %v895_v43 = vpop.f32.mrf.mxu1 }
 0x27a   : > { %v1420_v44 = vpack.c.bf16 %v2399_v39, %v2397_v38  ;;  %v1421_v45 = vpack.c.bf16 %v2401_v40, %v2392_v34  ;;  %v967_v48 = vmax.f32 %v966_v41, %v2383_v27  ;;  %v970_v49 = vmax.f32 %v2397_v38, %v2399_v39 }
 0x27b   : > { %v844_v46 = vpop.f32.mrf.mxu0  ;;  %v897_v47 = vpop.f32.mrf.mxu1  ;;  %v2413_v50 = vadd.f32 %v842_v42, %v605_v6  ;;  %v2415_v51 = vadd.f32 %v895_v43, %v613_v5 }
 0x27c   : > { %952 = vst [vmem:[%s2311_s8 + $0x20] sm:$0xff] %v1420_v44  ;;  %953 = vst [vmem:[%s2311_s8 + $0x28] sm:$0xff] %v1421_v45  ;;  %v2417_v52 = vadd.f32 %v844_v46, %v609_v7  ;;  %v2419_v53 = vadd.f32 %v897_v47, %v617_v8  ;;  %v971_v54 = vmax.f32 %v970_v49, %v2392_v34  ;;  %v2458_v8 = vld [vmem:[#allocation3 + $0x18] sm:$0xff] }
 0x27d   : > { %968 = vmax.xlane.f32.xlu0 %v967_v48 }
 0x27e   : > { %v1422_v55 = vpack.c.bf16 %v2417_v52, %v2413_v50  ;;  %v975_v56 = vmax.f32 %v2413_v50, %v2417_v52  ;;  %v1423_v57 = vpack.c.bf16 %v2419_v53, %v2415_v51  ;;  %v972_v58 = vmax.f32 %v971_v54, %v2401_v40 }
 0x280   : > { %954 = vst [vmem:[%s2311_s8 + $0x30] sm:$0xff] %v1422_v55  ;;  %955 = vst [vmem:[%s2311_s8 + $0x38] sm:$0xff] %v1423_v57  ;;  %v976_v59 = vmax.f32 %v975_v56, %v2415_v51  ;;  %973 = vmax.xlane.f32.xlu1 %v972_v58 }
 0x282   : > { %v977_v60 = vmax.f32 %v976_v59, %v2419_v53 }
 0x284   : > { %978 = vmax.xlane.f32.xlu1 %v977_v60 }
 0x302   : > { %v964_v62 = vpop.xlane.xlu0 %963 }
 0x303   : > { %v2436_v63 = vmax.f32 %v2433_v61, %v964_v62 }
 0x305   : > { %v988_v1 = vsub.f32 %v2433_v61, %v2436_v63  ;;  %1101 = vst.msk [vmem:[#allocation3] sm:$0xff] %vm1096_vm1, %v2436_v63  ;;  %1006 = vperm.xlu0 %1642, %v2436_v63  }
 0x306   : > { %v969_v2 = vpop.xlane.xlu0 %968 }
 0x307   : > { %v2446_v3 = vmax.f32 %v2438_v0, %v969_v2 }
 0x309   : > { %v989_v5 = vsub.f32 %v2438_v0, %v2446_v3  ;;  %1102 = vst.msk [vmem:[#allocation3 + $0x8] sm:$0xff] %vm1096_vm1, %v2446_v3  ;;  %1011 = vperm.xlu1 %1643, %v2446_v3   ;;  %v974_v6 = vpop.xlane.xlu1 %973 }
 0x30a   : > { %v2456_v7 = vmax.f32 %v2448_v4, %v974_v6 }
 0x30c   : > { %v990_v9 = vsub.f32 %v2448_v4, %v2456_v7  ;;  %1103 = vst.msk [vmem:[#allocation3 + $0x10] sm:$0xff] %vm1096_vm1, %v2456_v7  ;;  %v986_v4 = vld [vmem:[#allocation4 + $0x10] sm:$0xff] }
 0x30d   : > { %1016 = vperm.xlu1 %1643, %v2456_v7   ;;  %v979_v10 = vpop.xlane.xlu1 %978 }
 0x30e   : > { %v2466_v12 = vmax.f32 %v2458_v8, %v979_v10 }
 0x310   : > { %v991_v13 = vsub.f32 %v2458_v8, %v2466_v12  ;;  %1104 = vst.msk [vmem:[#allocation3 + $0x18] sm:$0xff] %vm1096_vm1, %v2466_v12 }
 0x311   : > { %1021 = vperm.xlu1 %1643, %v2466_v12  }
 0x380   : > { %v1007_v17 = vpop.permute.xlu0 %1006 }
 0x381   : > { %v1024_v18 = vsub.f32 %v2363_v14, %v1007_v17  ;;  %v1025_v19 = vsub.f32 %v2365_v15, %v1007_v17  ;;  %v1026_v20 = vsub.f32 %v2361_v11, %v1007_v17  ;;  %v1027_v21 = vsub.f32 %v2367_v16, %v1007_v17 }
 0x383   : > { %v1040_v22 = vmul.f32 1.442695, %v1024_v18  ;;  %v1042_v23 = vmul.f32 1.442695, %v1025_v19  ;;  %v1044_v28 = vmul.f32 1.442695, %v1026_v20 }
 0x384   : > { %v1046_v29 = vmul.f32 1.442695, %v1027_v21  ;;  %v1012_v30 = vpop.permute.xlu1 %1011 }
 0x385   : > { %1694 = vpow2.f32 %v1040_v22  ;;  %v1028_v31 = vsub.f32 %v2377_v24, %v1012_v30  ;;  %v1029_v32 = vsub.f32 %v2381_v26, %v1012_v30  ;;  %v1030_v33 = vsub.f32 %v2379_v25, %v1012_v30 }
 0x386   : > { %1696 = vpow2.f32 %v1042_v23  ;;  %v1031_v14 = vsub.f32 %v2383_v27, %v1012_v30 }
 0x387   : > { %1698 = vpow2.f32 %v1044_v28  ;;  %v1048_v15 = vmul.f32 1.442695, %v1028_v31  ;;  %v1050_v11 = vmul.f32 1.442695, %v1029_v32  ;;  %v1052_v35 = vmul.f32 1.442695, %v1030_v33 }
 0x388   : > { %1700 = vpow2.f32 %v1046_v29  ;;  %v1054_v16 = vmul.f32 1.442695, %v1031_v14  ;;  %v1017_v36 = vpop.permute.xlu1 %1016  ;;  %v992_v33 = vmul.f32 1.442695, %v988_v1  ;;  %v994_v14 = vmul.f32 1.442695, %v989_v5 }
 0x389   : > { %1702 = vpow2.f32 %v1048_v15  ;;  %v1032_v37 = vsub.f32 %v2397_v38, %v1017_v36  ;;  %v1033_v41 = vsub.f32 %v2399_v39, %v1017_v36  ;;  %v1034_v24 = vsub.f32 %v2392_v34, %v1017_v36 }
 0x38a   : > { %1704 = vpow2.f32 %v1050_v11  ;;  %v1035_v25 = vsub.f32 %v2401_v40, %v1017_v36  ;;  %v996_v15 = vmul.f32 1.442695, %v990_v9  ;;  %v998_v11 = vmul.f32 1.442695, %v991_v13  ;;  %v985_v36 = vld [vmem:[#allocation4 + $0x8] sm:$0xff]  ;;  %v987_v13 = vld [vmem:[#allocation4 + $0x18] sm:$0xff] }
 0x38b   : > { %1706 = vpow2.f32 %v1052_v35  ;;  %v1056_v26 = vmul.f32 1.442695, %v1032_v37  ;;  %v1058_v27 = vmul.f32 1.442695, %v1033_v41  ;;  %v1060_v42 = vmul.f32 1.442695, %v1034_v24 }
 0x38c   : > { %1708 = vpow2.f32 %v1054_v16  ;;  %v1062_v43 = vmul.f32 1.442695, %v1035_v25  ;;  %v1022_v44 = vpop.permute.xlu1 %1021  ;;  %v984_v16 = vld [vmem:[#allocation4] sm:$0xff] }
 0x38d   : > { %1710 = vpow2.f32 %v1056_v26  ;;  %v1036_v45 = vsub.f32 %v2413_v50, %v1022_v44  ;;  %v1037_v46 = vsub.f32 %v2417_v52, %v1022_v44  ;;  %v1038_v38 = vsub.f32 %v2415_v51, %v1022_v44 }
 0x38e   : > { %1712 = vpow2.f32 %v1058_v27  ;;  %v1039_v34 = vsub.f32 %v2419_v53, %v1022_v44 }
 0x38f   : > { %1714 = vpow2.f32 %v1060_v42  ;;  %v1064_v39 = vmul.f32 1.442695, %v1036_v45  ;;  %v1066_v40 = vmul.f32 1.442695, %v1037_v46  ;;  %v1068_v47 = vmul.f32 1.442695, %v1038_v38 }
 0x390   : > { %1716 = vpow2.f32 %v1062_v43  ;;  %v1070_v49 = vmul.f32 1.442695, %v1039_v34 }
 0x391   : > { %1718 = vpow2.f32 %v1064_v39 }
 0x392   : > { %v1695_v48 = vpop.eup %1694  ;;  %1720 = vpow2.f32 %v1066_v40 }
 0x393   : > { %v1697_v54 = vpop.eup %1696  ;;  %1722 = vpow2.f32 %v1068_v47 }
 0x394   : > { %v1699_v55 = vpop.eup %1698  ;;  %v1072_v50 = vadd.f32 %v1697_v54, %v1695_v48  ;;  %1724 = vpow2.f32 %v1070_v49 }
 0x395   : > { %v1701_v56 = vpop.eup %1700  ;;  %1726 = vpow2.f32 %v992_v33 }
 0x396   : > { %v1703_v52 = vpop.eup %1702  ;;  %v1073_v51 = vadd.f32 %v1699_v55, %v1072_v50  ;;  %1728 = vpow2.f32 %v994_v14 }
 0x397   : > { %v1705_v57 = vpop.eup %1704  ;;  %1730 = vpow2.f32 %v996_v15 }
 0x398   : > { %v1707_v58 = vpop.eup %1706  ;;  %v1074_v53 = vadd.f32 %v1701_v56, %v1073_v51  ;;  %v1077_v59 = vadd.f32 %v1705_v57, %v1703_v52  ;;  %1732 = vpow2.f32 %v998_v11 }
 0x399   : > { %v1709_v60 = vpop.eup %1708 }
 0x39a   : > { %v1711_v62 = vpop.eup %1710  ;;  %1075 = vadd.xlane.f32.xlu1 %v1074_v53  ;;  %v1078_v2 = vadd.f32 %v1707_v58, %v1077_v59 }
 0x39b   : > { %v1713_v6 = vpop.eup %1712 }
 0x39c   : > { %v1715_v10 = vpop.eup %1714  ;;  %v1079_v17 = vadd.f32 %v1709_v60, %v1078_v2  ;;  %v1082_v18 = vadd.f32 %v1713_v6, %v1711_v62 }
 0x39d   : > { %v1717_v19 = vpop.eup %1716 }
 0x39e   : > { %v1719_v20 = vpop.eup %1718  ;;  %1080 = vadd.xlane.f32.xlu0 %v1079_v17  ;;  %v1083_v21 = vadd.f32 %v1715_v10, %v1082_v18 }
 0x39f   : > { %v1721_v22 = vpop.eup %1720 }
 0x3a0   : > { %v1084_v23 = vadd.f32 %v1717_v19, %v1083_v21  ;;  %v1087_v28 = vadd.f32 %v1721_v22, %v1719_v20  ;;  %v1723_v29 = vpop.eup %1722 }
 0x3a1   : > { %v1725_v31 = vpop.eup %1724 }
 0x3a2   : > { %1085 = vadd.xlane.f32.xlu1 %v1084_v23  ;;  %v1088_v30 = vadd.f32 %v1723_v29, %v1087_v28  ;;  %v1727_v35 = vpop.eup %1726 }
 0x3a3   : > { %v1000_v61 = vmul.f32 %v1727_v35, %v984_v16  ;;  %v1729_v63 = vpop.eup %1728 }
 0x3a4   : > { %v1089_v32 = vadd.f32 %v1725_v31, %v1088_v30  ;;  %v1001_v0 = vmul.f32 %v1729_v63, %v985_v36  ;;  %v1731_v3 = vpop.eup %1730 }
 0x3a5   : > { %v1002_v9 = vmul.f32 %v1731_v3, %v986_v4  ;;  %v1733_v8 = vpop.eup %1732 }
 0x3a6   : > { %1090 = vadd.xlane.f32.xlu1 %v1089_v32  ;;  %v1003_v24 = vmul.f32 %v1733_v8, %v987_v13 }
 0x423   : > { %v1076_v1 = vpop.xlane.xlu1 %1075 }
 0x424   : > { %v1092_v37 = vadd.f32 %v1076_v1, %v1000_v61 }
 0x426   : > { %1097 = vst.msk [vmem:[#allocation4] sm:$0xff] %vm1096_vm1, %v1092_v37 }
 0x427   : > { %v1081_v5 = vpop.xlane.xlu0 %1080 }
 0x428   : > { %v1093_v7 = vadd.f32 %v1081_v5, %v1001_v0 }
 0x42a   : > { %1098 = vst.msk [vmem:[#allocation4 + $0x8] sm:$0xff] %vm1096_vm1, %v1093_v7 }
 0x42b   : > { %v1086_v12 = vpop.xlane.xlu1 %1085 }
 0x42c   : > { %v1094_v41 = vadd.f32 %v1086_v12, %v1002_v9 }
 0x42e   : > { %1099 = vst.msk [vmem:[#allocation4 + $0x10] sm:$0xff] %vm1096_vm1, %v1094_v41  ;;  %1108 = sbr.rel (%p1401_p13) target bundleno = 1101 (0x44d), region = 64 }
 0x42f   : > { %v1091_v25 = vpop.xlane.xlu1 %1090 }
 0x430   : > { %v1095_v26 = vadd.f32 %v1091_v25, %v1003_v24 }
 0x432   : > { %1100 = vst.msk [vmem:[#allocation4 + $0x18] sm:$0xff] %vm1096_vm1, %v1095_v26 }
 0x433   : > { %v1113_v27 = vld [vmem:[#allocation4] sm:$0xff]  ;;  %v1114_v42 = vld [vmem:[#allocation4 + $0x8] sm:$0xff]  ;;  %v1111_v48 = vld [vmem:[#allocation3 + $0x10] sm:$0xff] }
 0x434   : > { %1734 = vlog2.f32 %v1113_v27  ;;  %v1109_v46 = vld [vmem:[#allocation3] sm:$0xff]  ;;  %v1110_v39 = vld [vmem:[#allocation3 + $0x8] sm:$0xff]  ;;  %v1112_v50 = vld [vmem:[#allocation3 + $0x18] sm:$0xff] }
 0x435   : > { %v1115_v43 = vld [vmem:[#allocation4 + $0x10] sm:$0xff]  ;;  %1736 = vlog2.f32 %v1114_v42 }
 0x436   : > { %1738 = vlog2.f32 %v1115_v43 }
 0x439   : > { %v1116_v44 = vld [vmem:[#allocation4 + $0x18] sm:$0xff] }
 0x43a   : > { %1740 = vlog2.f32 %v1116_v44 }
 0x441   : > { %v1735_v45 = vpop.eup %1734 }
 0x442   : > { %v1737_v38 = vpop.eup %1736  ;;  %v1118_v34 = vmul.f32 0.6931472, %v1735_v45 }
 0x443   : > { %v1739_v40 = vpop.eup %1738  ;;  %v1120_v47 = vmul.f32 0.6931472, %v1737_v38 }
 0x444   : > { %v1125_v54 = vadd.f32 %v1118_v34, %v1109_v46  ;;  %v1122_v55 = vmul.f32 0.6931472, %v1739_v40 }
 0x445   : > { %v1126_v56 = vadd.f32 %v1120_v47, %v1110_v39 }
 0x446   : > { %1129 = vst.msk [vmem:[%s2308_s9] sm:$0xff] %vm1096_vm1, %v1125_v54  ;;  %v1127_v51 = vadd.f32 %v1122_v55, %v1111_v48 }
 0x447   : > { %v1741_v49 = vpop.eup %1740  ;;  %1130 = vst.msk [vmem:[%s2308_s9 + $0x8] sm:$0xff] %vm1096_vm1, %v1126_v56 }
 0x448   : > { %v1124_v52 = vmul.f32 0.6931472, %v1741_v49  ;;  %1131 = vst.msk [vmem:[%s2308_s9 + $0x10] sm:$0xff] %vm1096_vm1, %v1127_v51 }
 0x44a   : > { %v1128_v57 = vadd.f32 %v1124_v52, %v1112_v50 }
 0x44c   : > { %1132 = vst.msk [vmem:[%s2308_s9 + $0x18] sm:$0xff] %vm1096_vm1, %v1128_v57 }
 0x44d PF: > { %s2659_s18 = sld [smem:[#allocation18_spill]]  ;;  %s1155_s21 = sshll.u32 %s2311_s8, 4  ;;  %s2517_s21 = int_to_ptr.vmem [resolvable:$true] %s1155_s21 }
 0x44e   : > { %s2660_s1 = sld [smem:[#allocation19_spill]]  ;;  %s2526_s30 = scalar_lea.sflag [#allocation7], %s369_s15 }
 0x44f   : > { %s2661_s7 = sld [smem:[#allocation29_spill]]  ;;  %s1852_s17 = scalar_lea.vmem %s2517_s21, 1024 }
 0x450   : > { %p1853_p0 = scmp.ne.s32.totalorder %s2517_s21, %s1852_s17  ;;  %p2663_p4 = scmp.ne.s32.totalorder %s2642_s2, 0 }
 0x451   : > { %s2018_s8 = smov [#allocation12]  }
 0x452   : > { %p1854_p8 = pnand %p1853_p0, %p2663_p4  ;;  %s1856_s3 = sshll.u32 %s2018_s8, 4  ;;  %s1857_s3 = int_to_ptr.vmem [resolvable:$false] %s1856_s3 }
 0x453   : > { %s1404_s14 = sshll.u32 %s2659_s18, 2  ;;  %s1858_s13 = scalar_lea.vmem %s1857_s3, 2048 }
 0x454   : > { %s1424_s27 = sshll.u32 %s2660_s1, 5  ;;  %p1855_p2 = pneg %p1854_p8 }
 0x455   : > { %s1152_s6 = sadd.s32 %s1424_s27, %s1404_s14  ;;  %s2662_s19 = smov %s2661_s7 }
 0x456   : > { %s1406_s5 = sshll.u32 %s1152_s6, 6  ;;  %p1859_p9 = scmp.lt.s32.totalorder %s2517_s21, %s1857_s3 }
 0x457   : > { %s2522_s9 = scalar_lea.hbm %s2661_s7, %s1406_s5  ;;  %p1860_p11 = scmp.lt.s32.totalorder %s1858_s13, %s1852_s17 }
 0x459   : > { %p1861_p12 = por %p1860_p11, %p1859_p9 }
 0x45b   : > { %p1862_p3 = pnand %p1861_p12, %p1855_p2 }
 0x45d   : > { %1865 = shalt.err (!%p1862_p3)
}
 0x45e   : > { %s1866_s15 = scalar_lea.hbm %s2522_s9, 1024  ;;  %s1870_s1 = scalar_lea.hbm %s2662_s19, 4096 }
 0x45f   : > { %p1867_p10 = scmp.ne.s32.totalorder %s2522_s9, %s1866_s15  ;;  %p1871_p7 = scmp.lt.s32.totalorder %s2522_s9, %s2662_s19 }
 0x460   : > { %p1872_p6 = scmp.lt.s32.totalorder %s1870_s1, %s1866_s15 }
 0x461   : > { %p1868_p5 = pnand %p1867_p10, %p2663_p4 }
 0x462   : > { %p1873_p13 = por %p1872_p6, %p1871_p7 }
 0x463   : > { %p1869_p1 = pneg %p1868_p5 }
 0x465   : > { %p1874_p0 = pnand %p1873_p13, %p1869_p1 }
 0x467   : > { %1877 = shalt.err (!%p1874_p0)
}
 0x468   : > { %s2019_s6 = smov 256   ;;  %s2020_s5 = smov 512  }
 0x469   : > { %s2021_s0 = smov 16  }
 0x46a   : > { %1476 = dma.vmem_to_hbm [thread:$0]  (%p2663_p4), %s2517_s21, 1024, %s2522_s9, %s2526_s30, %s2019_s6, %s2020_s5, %s2021_s0  }
 0x46b PF: > { %s2664_s4 = sld [smem:[#allocation17_spill]]  ;;  %p1499_p8 = scmp.ge.s32.totalorder %s2004_s10, 2 }
 0x46c   : > { %p2665_p2 = scmp.ne.s32.totalorder %s2643_s24, 0 }
 0x46e   : > { %p1493_p9 = pnand %p1499_p8, %p2665_p2 }
 0x470   : > { %p1494_p11 = pneg %p1493_p9 }
 0x471   : > { %s1174_s7 = sand.u32 1, %s2664_s4  }
 0x472   : > { %s1175_s17 = scalar_lea.sflag [#allocation7], %s1174_s7 }
 0x473   : > { %1947 = dma.done.wait (%p1494_p11), %s1175_s17, 1024  }
 0x474   : > { %1949 = vsyncadd (%p1494_p11), %s1175_s17, 4294966272  ;;  %s24_s10 = sadd.s32 1, %s2004_s10   ;;  %s2667_s30 = sld [smem:[#allocation20_spill]] }
 0x475   : > { %p2554_p12 = scmp.ge.s32.totalorder %s24_s10, 6   ;;  %s2668_s7 = sld [smem:[#allocation21_spill]] }
 0x476   : > { %s2669_s2 = sld [smem:[#allocation22_spill]]  ;;  %s2672_s21 = smov %s1956_s22 }
 0x477   : > { %s2670_s9 = sld [smem:[#allocation23_spill]]  ;;  %s2673_s22 = smov %s1960_s23 }
 0x478   : > { %s2674_s23 = smov %s2159_s11  ;;  %s2675_s24 = smov %s1968_s25 }
 0x479   : > { %s2676_s25 = smov %s1972_s26  ;;  %s2677_s26 = smov %s2190_s16 }
 0x47a   : > { %s2678_s27 = smov %s1980_s28  ;;  %s2679_s28 = smov %s1984_s29 }
 0x47b   : > { %s2680_s29 = smov %s2156_s20  ;;  %23 = sbr.rel (!%p2554_p12) target bundleno = 19 (0x13), region = 131 }
 0x47c   : > { %s2681_s8 = smov %s2669_s2 }
 0x480   :  { %1188 = vsyncpa [#allocation6], 1 }
 0x481   :  { %1190 = vsyncpa [#allocation6 + $0x1], 1 }
 0x482   :  { %1191 = vsyncpa [#allocation9], 1 }
 0x483   :  { %1192 = vsyncpa [#allocation7], 1 }
 0x484   :  { %1194 = vsyncpa [#allocation7 + $0x1], 1 }

// kernel: tpu_custom_call.1
= control target key start
LH: loop header
LB: loop body
LE: loop exit
PB: predicated region body
PF: predicated region fallthrough
CT: control target
= control target key end

     0   :  { %s2601_s0 = inlined_call_operand.hbm [shape: bf16[64,128], index: 0, kind: input, shape index: {}]   ;;  %s2602_s1 = inlined_call_operand.hbm [shape: bf16[128,128], index: 1, kind: input, shape index: {}]   ;;  %s2603_s2 = inlined_call_operand.vmem [shape: f32[1,128], index: 2, kind: input, shape index: {}]   ;;  %s2604_s3 = inlined_call_operand.hbm [shape: bf16[128,1024], index: 3, kind: input, shape index: {}]   ;;  %s2605_s4 = inlined_call_operand.hbm [shape: f32[1,1024], index: 4, kind: input, shape index: {}]   ;;  %s2606_s5 = inlined_call_operand.hbm [shape: bf16[64,1024], index: 5, kind: output, shape index: {0}]   ;;  %s2607_s6 = inlined_call_operand.vmem [shape: f32[64,1], index: 6, kind: output, shape index: {1}]  }
   0x1   :  { %2620 = sst [smem:[#allocation24_spill]] %s2601_s0 }
   0x2   :  { %2621 = sst [smem:[#allocation25_spill]] %s2602_s1 }
   0x3   :  { %2622 = sst [smem:[#allocation26_spill]] %s2603_s2 }
   0x4   :  { %2623 = sst [smem:[#allocation27_spill]] %s2604_s3 }
   0x5   :  { %2624 = sst [smem:[#allocation28_spill]] %s2605_s4 }
   0x6   :  { %2625 = sst [smem:[#allocation29_spill]] %s2606_s5 }
   0x7   :  { %2626 = sst [smem:[#allocation30_spill]] %s2607_s6 }
   0x8   :  { %12 = vsyncpa [#allocation6], 0 }
   0x9   :  { %14 = vsyncpa [#allocation6 + $0x1], 0 }
   0xa   :  { %15 = vsyncpa [#allocation9], 0 }
   0xb   :  { %16 = vsyncpa [#allocation7], 0 }
   0xc   :  { %18 = vsyncpa [#allocation7 + $0x1], 0  ;;  %s2057_s21 = smov 0   ;;  %s2059_s22 = smov 0  }
   0xd   :  { %s2061_s23 = smov 0   ;;  %s2063_s24 = smov 0  }
   0xe   :  { %s2065_s25 = smov 0   ;;  %s2067_s26 = smov 0  }
   0xf   :  { %s2069_s27 = smov 0   ;;  %s2071_s28 = smov 0  }
  0x10   :  { %s2073_s29 = smov 0   ;;  %s2075_s30 = smov 0  }
  0x11   :  { %s2077_s7 = smov 0   ;;  %s2079_s8 = smov 0  }
  0x12   :  { %s2081_s9 = smov 0   ;;  %s2083_s10 = smov 0  }
  0x13 LB: > { %2627 = sst [smem:[#allocation17_spill]] %s1952_s21  ;;  %s33_s11 = sadd.s32 1, %s1996_s8  ;;  %s2004_s10 = sphi %s2083_s10, %s24_s10   ;;  %s2000_s9 = sphi %s2081_s9, %s2670_s9   ;;  %s1996_s8 = sphi %s2079_s8, %s2681_s8   ;;  %s1992_s7 = sphi %s2077_s7, %s2668_s7   ;;  %s1988_s30 = sphi %s2075_s30, %s2667_s30   ;;  %s1984_s29 = sphi %s2073_s29, %s2680_s29   ;;  %s1980_s28 = sphi %s2071_s28, %s2679_s28   ;;  %s1976_s27 = sphi %s2069_s27, %s2678_s27   ;;  %s1972_s26 = sphi %s2067_s26, %s2677_s26   ;;  %s1968_s25 = sphi %s2065_s25, %s2676_s25   ;;  %s1964_s24 = sphi %s2063_s24, %s2675_s24   ;;  %s1960_s23 = sphi %s2061_s23, %s2674_s23   ;;  %s1956_s22 = sphi %s2059_s22, %s2673_s22   ;;  %s1952_s21 = sphi %s2057_s21, %s2672_s21  }
  0x14   : > { %2628 = sst [smem:[#allocation18_spill]] %s1988_s30  ;;  %s36_s12 = sadd.s32 1, %s2000_s9 }
  0x15   : > { %2629 = sst [smem:[#allocation19_spill]] %s1992_s7  ;;  %p34_p0 = scmp.ge.s32.totalorder %s33_s11, 2 }
  0x16   : > { %2630 = sst [smem:[#allocation20_spill]] %s1996_s8  ;;  %s43_s13 = sadd.s32 1, %s1984_s29 }
  0x17   : > { %2631 = sst [smem:[#allocation21_spill]] %s2000_s9  ;;  %p50_p1 = scmp.ne.s32.totalorder %s1984_s29, %s1980_s28 }
  0x18   : > { %p51_p2 = scmp.eq.s32.totalorder %s2004_s10, 0  ;;  %s2683_s11 = smov (%p34_p0, %s33_s11), 0 }
  0x19   : > { %2632 = sst [smem:[#allocation22_spill]] %s2683_s11  ;;  %s2685_s12 = smov (!%p34_p0, %s36_s12), %s2000_s9 }
  0x1a   : > { %p2138_p3 = por %p51_p2, %p50_p1  ;;  %s2144_s15 = ssub.s32 %s1996_s8, %s2683_s11 }
  0x1b   : > { %p38_p4 = scmp.ge.s32.totalorder %s2685_s12, 2  ;;  %p109_p5 = scmp.eq.s32.totalorder %s2144_s15, 0 }
  0x1c   : > { %s165_s16 = sadd.s32 1, %s1960_s23  ;;  %p1497_p6 = scmp.lt.s32.totalorder %s2004_s10, 4 }
  0x1d   : > { %s2687_s12 = smov (%p38_p4, %s2685_s12), 0  ;;  %s244_s19 = sand.u32 1, %s2004_s10  }
  0x1e   : > { %2634 = sst [smem:[#allocation23_spill]] %s2687_s12  ;;  %s40_s17 = ssub.s32 %s2000_s9, %s2687_s12 }
  0x1f   : > { %p41_p7 = scmp.eq.s32.totalorder %s40_s17, 0  ;;  %s162_s18 = sor.u32 %s2144_s15, %s40_s17 }
  0x20   : > { %p163_p8 = scmp.eq.s32.totalorder %s162_s18, 0  ;;  %s246_s5 = sand.u32 1, %s1984_s29  }
  0x21   : > { %s2156_s20 = scalar_select %p41_p7, %s1984_s29, %s43_s13  }
  0x22   : > { %s2159_s11 = scalar_select %p163_p8, %s1960_s23, %s165_s16  }
  0x23   : > { %s1326_s2 = sshll.u32 %s246_s5, 4  ;;  %s1409_s30 = sshll.u32 %s2000_s9, 8 }
  0x24   : > { %s2635_s0 = sld [smem:[#allocation24_spill]]  ;;  %s248_s4 = scalar_lea.vmem [#allocation5], %s1326_s2 }
  0x25   : > { %s255_s21 = sshll.u32 %s248_s4, 4  ;;  %p2170_p9 = pnand %p1497_p6, %p2138_p3  ;;  %s256_s21 = int_to_ptr.vmem [resolvable:$true] %s255_s21 }
  0x26   : > { %s2174_s13 = scalar_lea.sflag [#allocation6], %s244_s19  ;;  %s1755_s5 = scalar_lea.vmem %s256_s21, 256 }
  0x27   : > { %p1744_p10 = pneg %p2170_p9  ;;  %p1756_p11 = scmp.ne.s32.totalorder %s256_s21, %s1755_s5 }
  0x28   : > { %s2006_s6 = smov [#allocation5]  }
  0x29   : > { %p1758_p12 = pnand %p1756_p11, %p1744_p10 }
  0x2a   : > { %s254_s1 = scalar_lea.hbm %s2635_s0, %s1409_s30  ;;  %s1760_s30 = sshll.u32 %s2006_s6, 4  ;;  %s1761_s30 = int_to_ptr.vmem [resolvable:$false] %s1760_s30 }
  0x2b   : > { %p1759_p13 = pneg %p1758_p12  ;;  %s1762_s2 = scalar_lea.vmem %s1761_s30, 512 }
  0x2c   : > { %p1763_p0 = scmp.lt.s32.totalorder %s256_s21, %s1761_s30  ;;  %p1764_p1 = scmp.lt.s32.totalorder %s1762_s2, %s1755_s5 }
  0x2e   : > { %p1765_p3 = por %p1764_p1, %p1763_p0 }
  0x30   : > { %p1766_p4 = pnand %p1765_p3, %p1759_p13 }
  0x32   : > { %1769 = shalt.err (!%p1766_p4)
}
  0x33   : > { %s2612_s4 = smov 64   ;;  %s2613_s7 = smov 4  }
  0x34   : > { %1485 = dma.hbm_to_vmem [thread:$0]  (!%p2170_p9), %s254_s1, 256, %s256_s21, %s2174_s13, %s2612_s4, %s2612_s4, %s2613_s7  }
  0x35   : > { %s111_s14 = sadd.s32 1, %s1972_s26  ;;  %p118_p7 = scmp.ne.s32.totalorder %s1972_s26, %s1968_s25 }
  0x36   : > { %s2190_s16 = scalar_select %p109_p5, %s1972_s26, %s111_s14  }
  0x37   : > { %p120_p8 = por %p118_p7, %p51_p2  ;;  %s267_s17 = sand.u32 1, %s1972_s26  }
  0x38   : > { %s1329_s18 = sshll.u32 %s267_s17, 8  ;;  %s1410_s19 = sshll.u32 %s1996_s8, 8 }
  0x39   : > { %s2637_s3 = sld [smem:[#allocation27_spill]]  ;;  %s269_s12 = scalar_lea.vmem [#allocation10], %s1329_s18 }
  0x3a   : > { %s276_s2 = sshll.u32 %s269_s12, 4  ;;  %p2203_p10 = pnand %p1497_p6, %p120_p8  ;;  %s277_s2 = int_to_ptr.vmem [resolvable:$true] %s276_s2 }
  0x3b   : > { %s1783_s21 = scalar_lea.vmem %s277_s2, 4096  ;;  %s2009_s15 = smov [#allocation10]  }
  0x3c   : > { %p2611_p2 = pneg %p2203_p10  ;;  %p1784_p5 = scmp.ne.s32.totalorder %s277_s2, %s1783_s21 }
  0x3d   : > { %s1788_s14 = sshll.u32 %s2009_s15, 4  ;;  %s1789_s14 = int_to_ptr.vmem [resolvable:$false] %s1788_s14 }
  0x3e   : > { %p1786_p9 = pnand %p1784_p5, %p2611_p2  ;;  %s1790_s18 = scalar_lea.vmem %s1789_s14, 8192 }
  0x3f   : > { %s275_s30 = scalar_lea.hbm %s2637_s3, %s1410_s19  ;;  %p1791_p12 = scmp.lt.s32.totalorder %s277_s2, %s1789_s14 }
  0x40   : > { %p1787_p11 = pneg %p1786_p9  ;;  %p1792_p6 = scmp.lt.s32.totalorder %s1790_s18, %s1783_s21 }
  0x42   : > { %p1793_p13 = por %p1792_p6, %p1791_p12 }
  0x44   : > { %p1794_p0 = pnand %p1793_p13, %p1787_p11 }
  0x46   : > { %1797 = shalt.err (!%p1794_p0)
}
  0x47   : > { %s2010_s19 = smov 512   ;;  %s2639_s5 = sld [smem:[#allocation17_spill]] }
  0x48   : > { %s2011_s6 = smov 256   ;;  %s2012_s12 = smov 16  }
  0x49   : > { %1488 = dma.hbm_to_vmem [thread:$0]  (!%p2203_p10), %s275_s30, 4096, %s277_s2, %s2174_s13, %s2010_s19, %s2011_s6, %s2012_s12  }
  0x4a   : > { %s2216_s21 = sadd.s32 4294967295, %s2004_s10   ;;  %s1322_s15 = sadd.s32 4294967294, %s2004_s10  }
  0x4b   : > { %p56_p1 = scmp.ne.s32.totalorder %s1980_s28, %s1976_s27  ;;  %p2618_p3 = scmp.eq.s32.totalorder %s2216_s21, 0 }
  0x4c   : > { %p124_p4 = scmp.ne.s32.totalorder %s1968_s25, %s1964_s24  ;;  %p175_p7 = scmp.ne.s32.totalorder %s1960_s23, %s1956_s22 }
  0x4d   : > { %p176_p8 = scmp.eq.s32.totalorder %s2216_s21, 3  ;;  %p2229_p5 = por %p2618_p3, %p56_p1 }
  0x4e   : > { %p2235_p9 = por %p124_p4, %p2618_p3  ;;  %p181_p12 = scmp.ne.s32.totalorder %s1956_s22, %s2639_s5 }
  0x4f   : > { %s2640_s14 = scalar_select %p2229_p5, 1, 0 }
  0x50   : > { %s2641_s30 = scalar_select %p2235_p9, 1, 0 }
  0x51   : > { %p2239_p11 = por %p176_p8, %p175_p7  ;;  %p182_p6 = scmp.eq.s32.totalorder %s1322_s15, 3 }
  0x52   : > { %p1323_p13 = scmp.ge.s32.totalorder %s2004_s10, 1  ;;  %p215_p0 = scmp.lt.s32.totalorder %s2004_s10, 5 }
  0x53   : > { %s2642_s2 = scalar_select %p2239_p11, 1, 0 }
  0x54   : > { %p2247_p2 = por %p182_p6, %p181_p12  ;;  %p2251_p1 = pnand %p1323_p13, %p215_p0 }
  0x55   : > { %s2013_s18 = smov [#allocation8]   ;;  %s1332_s6 = sshll.u32 %s267_s17, 2 }
  0x56   : > { %s2643_s24 = scalar_select %p2247_p2, 1, 0 }
  0x57   : > { %s227_s19 = sshll.u32 %s2013_s18, 4  ;;  %p1478_p4 = pneg %p2251_p1  ;;  %s228_s19 = int_to_ptr.vmem [resolvable:$true] %s227_s19 }
  0x58   : > { %s1411_s12 = sshll.u32 %s1996_s8, 6  ;;  %s290_s5 = scalar_lea.vmem [#allocation11], %s1332_s6 }
  0x59   : > { %s298_s15 = sshll.u32 %s290_s5, 4  ;;  %p1479_p7 = pnand %p1478_p4, %p2618_p3  ;;  %s299_s15 = int_to_ptr.vmem [resolvable:$true] %s298_s15 }
  0x5a   : > { %s2645_s0 = sld [smem:[#allocation28_spill]]  ;;  %s1809_s9 = scalar_lea.vmem %s228_s19, 1024 }
  0x5b   : > { %p1800_p8 = pneg %p1479_p7  ;;  %p1810_p12 = scmp.ne.s32.totalorder %s228_s19, %s1809_s9 }
  0x5c   : > { %p1817_p0 = scmp.lt.s32.totalorder %s228_s19, %s228_s19  ;;  %p1818_p2 = scmp.lt.s32.totalorder %s1809_s9, %s1809_s9 }
  0x5d   : > { %p1812_p6 = pnand %p1810_p12, %p1800_p8 }
  0x5e   : > { %p1819_p11 = por %p1818_p2, %p1817_p0 }
  0x5f   : > { %p1813_p13 = pneg %p1812_p6 }
  0x60   : > { %s296_s3 = scalar_lea.hbm %s2645_s0, %s1411_s12 }
  0x61   : > { %p1820_p9 = pnand %p1819_p11, %p1813_p13 }
  0x63   : > { %1823 = shalt.err (!%p1820_p9)
}
  0x64   : > { %s2646_s17 = smov 4   ;;  %s2647_s18 = smov 64  }
  0x65   : > { %s2648_s8 = sld [smem:[#allocation25_spill]]  ;;  %s1837_s0 = scalar_lea.vmem %s299_s15, 64 }
  0x66   : > { %p1838_p4 = scmp.ne.s32.totalorder %s299_s15, %s1837_s0  ;;  %p2649_p3 = pneg %p2203_p10 }
  0x67   : > { %s2014_s4 = smov [#allocation11]  }
  0x68   : > { %p1840_p5 = pnand %p1838_p4, %p2649_p3  ;;  %s1842_s7 = sshll.u32 %s2014_s4, 4  ;;  %s1843_s7 = int_to_ptr.vmem [resolvable:$false] %s1842_s7 }
  0x69   : > { %s1844_s9 = scalar_lea.vmem %s1843_s7, 128  ;;  %p1845_p2 = scmp.lt.s32.totalorder %s299_s15, %s1843_s7 }
  0x6a   : > { %p1841_p8 = pneg %p1840_p5  ;;  %p1846_p9 = scmp.lt.s32.totalorder %s1844_s9, %s1837_s0 }
  0x6b   : > { %1481 = dma.hbm_to_vmem [thread:$0]  (!%p1479_p7), %s2648_s8, 1024, %s228_s19, [#allocation9], %s2647_s18, %s2647_s18, %s2646_s17  }
  0x6c   : > { %p1847_p11 = por %p1846_p9, %p1845_p2 }
  0x6e   : > { %p1848_p12 = pnand %p1847_p11, %p1841_p8 }
  0x70   : > { %1851 = shalt.err (!%p1848_p12)
}
  0x71   : > { %1491 = dma.hbm_to_vmem [thread:$0]  (!%p2203_p10), %s296_s3, 64, %s299_s15, %s2174_s13  }
  0x72   : > { %307 = sbr.rel (%p2251_p1) target bundleno = 1131 (0x46b), region = 40  ;;  %s309_s8 = sand.u32 (!%p2251_p1), 1, %s2216_s21  }
  0x73   : > { %s311_s19 = sand.u32 (!%p2251_p1), 1, %s1980_s28   ;;  %s310_s17 = scalar_lea.sflag (!%p2251_p1), [#allocation6], %s309_s8 }
  0x74   : > { %s2281_s12 = sshll.u32 (!%p2251_p1), %s311_s19, 4  ;;  %p2650_p3 = scmp.ne.s32.totalorder (!%p2251_p1), %s2640_s14, 0 }
  0x75   : > { %s313_s18 = scalar_lea.vmem (!%p2251_p1), [#allocation5], %s2281_s12 }
  0x77   : > { %1935 = dma.done.wait (%p2650_p3), %s310_s17, 256  }
  0x78   : > { %1937 = vsyncadd (%p2650_p3), %s310_s17, 4294967040  ;;  %p2651_p10 = scmp.eq.s32.totalorder %s2216_s21, 0 }
  0x7a   : > { %1939 = dma.done.wait (%p2651_p10), [#allocation9], 1024   ;;  %p2652_p5 = pmov %p2651_p10 }
  0x7b   : > { %s324_s3 = sand.u32 1, %s1968_s25   ;;  %p2653_p1 = scmp.ne.s32.totalorder %s2641_s30, 0 }
  0x7c   : > { %1941 = vsyncadd (%p2652_p5), [#allocation9], 4294966272  ;;  %s1338_s13 = sshll.u32 %s324_s3, 8 }
  0x7d   : > { %s2293_s1 = scalar_lea.vmem [#allocation10], %s1338_s13 }
  0x7e   : > { %1943 = dma.done.wait (%p2653_p1), %s310_s17, 4160  }
  0x7f   : > { %1945 = vsyncadd (%p2653_p1), %s310_s17, 4294963136  ;;  %s2654_s14 = sld [smem:[#allocation19_spill]]  ;;  %s2299_s27 = sshll.u32 %s324_s3, 2 }
  0x80   : > { %s369_s15 = sand.u32 1, %s1956_s22   ;;  %s2655_s7 = sld [smem:[#allocation30_spill]] }
  0x81   : > { %s1340_s21 = sshll.u32 %s369_s15, 6  ;;  %s335_s30 = scalar_lea.vmem [#allocation11], %s2299_s27 }
  0x82   : > { %s2311_s8 = scalar_lea.vmem [#allocation12], %s1340_s21  ;;  %s2656_s19 = sld [smem:[#allocation18_spill]] }
  0x85   : > { %s1341_s6 = sshll.u32 %s2654_s14, 2 }
  0x86   : > { %p385_p7 = scmp.lt.s32.totalorder %s1341_s6, 7 }
  0x88   : > { %s2689_s6 = smov (!%p385_p7, %s1341_s6), 7  ;;  %p1343_p6 = scmp.ne.s32.totalorder %s2656_s19, 0 }
  0x89   : > { %s1342_s5 = sshll.u32 %s2689_s6, 3  ;;  %s2657_s13 = sld [smem:[#allocation26_spill]] (!%p1343_p6) }
  0x8a   : > { %s2308_s9 = scalar_lea.vmem %s2655_s7, %s1342_s5  ;;  %394 = sbr.rel (%p1343_p6) target bundleno = 394 (0x18a), region = 60 }
  0x8f   : > { %v1624_v0 = vld [vmem:[#allocation8 + $0x38] sm:$0xff]   ;;  %v1625_v1 = vld [vmem:[#allocation8 + $0x30] sm:$0xff]   ;;  %v1626_v2 = vld [vmem:[#allocation8 + $0x28] sm:$0xff]   ;;  %vm555_vm0 = vcmask 7168   ;;  %v2015_v10 = vmov -1e+30  }
  0x90   : > { %1446 = vmatprep.subr.bf16.mxu0 %v1624_v0  ;;  %v1627_v3 = vld [vmem:[#allocation8 + $0x20] sm:$0xff]   ;;  %v1628_v5 = vld [vmem:[#allocation8 + $0x18] sm:$0xff]   ;;  %v1629_v6 = vld [vmem:[#allocation8 + $0x10] sm:$0xff]   ;;  %556 = vst.msk [vmem:[#allocation3] sm:$0xff] %vm555_vm0, %v2015_v10  ;;  %v2016_v11 = vmov 0.0  }
  0x91   : > { %1447 = vmatpush3.bf16.msra.mxu0 %v1624_v0  ;;  %v1632_v4 = vld [vmem:[%s313_s18] sm:$0xff]   ;;  %v1630_v7 = vld [vmem:[#allocation8 + $0x8] sm:$0xff]   ;;  %557 = vst.msk [vmem:[#allocation3 + $0x8] sm:$0xff] %vm555_vm0, %v2015_v10  ;;  %558 = vst.msk [vmem:[#allocation3 + $0x10] sm:$0xff] %vm555_vm0, %v2015_v10 }
  0x92   : > { %1448 = vmatprep.subr.bf16.mxu0 %v1625_v1  ;;  %1462 = vmatprep.mubr.bf16.mxu0 %v1632_v4  ;;  %v1631_v8 = vld [vmem:[#allocation8] sm:$0xff]   ;;  %v1633_v9 = vld [vmem:[%s313_s18 + $0x8] sm:$0xff]   ;;  %559 = vst.msk [vmem:[#allocation3 + $0x18] sm:$0xff] %vm555_vm0, %v2015_v10  ;;  %560 = vst.msk [vmem:[#allocation4] sm:$0xff] %vm555_vm0, %v2016_v11 }
  0x93   : > { %561 = vst.msk [vmem:[#allocation4 + $0x8] sm:$0xff] %vm555_vm0, %v2016_v11  ;;  %562 = vst.msk [vmem:[#allocation4 + $0x10] sm:$0xff] %vm555_vm0, %v2016_v11  ;;  %v1344_v12 = vld [vmem:[%s2657_s13] ss:$0 sm:$0xff] }
  0x94   : > { %563 = vst.msk [vmem:[#allocation4 + $0x18] sm:$0xff] %vm555_vm0, %v2016_v11 }
  0x95   : > { %1449 = vmatpush3.bf16.msra.mxu0 %v1625_v1 }
  0x96   : > { %1450 = vmatprep.subr.bf16.mxu0 %v1626_v2 }
  0x99   : > { %1451 = vmatpush3.bf16.msra.mxu0 %v1626_v2 }
  0x9a   : > { %1452 = vmatprep.subr.bf16.mxu0 %v1627_v3 }
  0x9d   : > { %1453 = vmatpush3.bf16.msra.mxu0 %v1627_v3 }
  0x9e   : > { %1454 = vmatprep.subr.bf16.mxu0 %v1628_v5 }
  0xa1   : > { %1455 = vmatpush3.bf16.msra.mxu0 %v1628_v5 }
  0xa2   : > { %1456 = vmatprep.subr.bf16.mxu0 %v1629_v6 }
  0xa5   : > { %1457 = vmatpush3.bf16.msra.mxu0 %v1629_v6 }
  0xa6   : > { %1458 = vmatprep.subr.bf16.mxu0 %v1630_v7 }
  0xa9   : > { %1459 = vmatpush3.bf16.msra.mxu0 %v1630_v7 }
  0xaa   : > { %1460 = vmatprep.subr.bf16.mxu0 %v1631_v8 }
  0xad   : > { %1461 = vmatpush3.bf16.msra.mxu0 %v1631_v8 }
  0xb0   : > { %1463 = vmatmul.mubr.bf16.vlgmr.msra.gmra.mxu0 %v1633_v9 }
 0x170   : > { %v1464_v13 = vpop.f32.mrf.mxu0 }
 0x171   : > { %v525_v14 = vadd.f32 %v1464_v13, %v1344_v12 }
 0x172   : > { %v516_v15 = vpop.f32.mrf.mxu0 }
 0x173   : > { %v517_v16 = vadd.f32 %v1344_v12, %v516_v15  ;;  %1634 = vtanh.f32 %v525_v14 }
 0x174   : > { %v1465_v17 = vpop.f32.mrf.mxu0 }
 0x175   : > { %v528_v18 = vadd.f32 %v1465_v17, %v1344_v12 }
 0x176   : > { %v519_v19 = vpop.f32.mrf.mxu0 }
 0x177   : > { %1636 = vtanh.f32 %v528_v18  ;;  %v520_v20 = vadd.f32 %v1344_v12, %v519_v19 }
 0x178   : > { %1638 = vtanh.f32 %v517_v16 }
 0x179   : > { %1640 = vtanh.f32 %v520_v20 }
 0x180   : > { %v1635_v21 = vpop.eup %1634 }
 0x184   : > { %v1637_v22 = vpop.eup %1636 }
 0x185   : > { %v1639_v23 = vpop.eup %1638  ;;  %v1433_v24 = vpack.c.bf16 %v1637_v22, %v1635_v21 }
 0x186   : > { %v1641_v25 = vpop.eup %1640 }
 0x187   : > { %1435 = vst [vmem:[#allocation2 + $0x8] sm:$0xff] %v1433_v24   ;;  %v1428_v26 = vpack.c.bf16 %v1641_v25, %v1639_v23 }
 0x189   : > { %1429 = vst [vmem:[#allocation2] sm:$0xff] %v1428_v26  }
 0x18a PF: > { %v1644_v27 = vld [vmem:[%s2293_s1 + $0xe4] ss:$16 sps:$4 sm:$0xff]   ;;  %v1646_v28 = vld [vmem:[%s2293_s1 + $0xec] ss:$16 sps:$4 sm:$0xff]   ;;  %v2017_v29 = vmov 0   ;;  %v602_v62 = vlaneseq  ;;  %vm1096_vm1 = vcmask 7168  }
 0x18b   : > { %826 = vmatprep.mubr.bf16.mxu0 %v2017_v29  ;;  %879 = vmatprep.mubr.bf16.mxu1 %v2017_v29  ;;  %v1648_v30 = vld [vmem:[%s2293_s1 + $0xe0] ss:$16 sps:$4 sm:$0xff]   ;;  %v1649_v31 = vld [vmem:[%s2293_s1 + $0xe8] ss:$16 sps:$4 sm:$0xff]   ;;  %v1650_v32 = vld [vmem:[%s2293_s1 + $0xc4] ss:$16 sps:$4 sm:$0xff]  }
 0x18c   : > { %794 = vmatprep.subr.bf16.mxu0 %v1644_v27  ;;  %1642 = vset.pattern.permute.xlu0 %v2017_v29  ;;  %v1652_v33 = vld [vmem:[%s2293_s1 + $0xcc] ss:$16 sps:$4 sm:$0xff]   ;;  %v1654_v34 = vld [vmem:[%s2293_s1 + $0xc0] ss:$16 sps:$4 sm:$0xff]   ;;  %v1655_v35 = vld [vmem:[%s2293_s1 + $0xc8] ss:$16 sps:$4 sm:$0xff]  }
 0x18d   : > { %847 = vmatprep.subr.bf16.mxu1 %v1646_v28  ;;  %1643 = vset.pattern.permute.xlu1 %v2017_v29  ;;  %v1656_v36 = vld [vmem:[%s2293_s1 + $0xa4] ss:$16 sps:$4 sm:$0xff]   ;;  %v1658_v37 = vld [vmem:[%s2293_s1 + $0xac] ss:$16 sps:$4 sm:$0xff]   ;;  %v1660_v38 = vld [vmem:[%s2293_s1 + $0xa0] ss:$16 sps:$4 sm:$0xff]  }
 0x18e   : > { %795 = vmatpush1.bf16.msra.mxu0 %v1648_v30  ;;  %848 = vmatpush1.bf16.msra.mxu1 %v1649_v31  ;;  %v1661_v39 = vld [vmem:[%s2293_s1 + $0xa8] ss:$16 sps:$4 sm:$0xff]   ;;  %v1662_v40 = vld [vmem:[%s2293_s1 + $0x84] ss:$16 sps:$4 sm:$0xff]   ;;  %v1664_v41 = vld [vmem:[%s2293_s1 + $0x8c] ss:$16 sps:$4 sm:$0xff]  }
 0x18f   : > { %796 = vmatprep.subr.bf16.mxu0 %v1650_v32  ;;  %849 = vmatprep.subr.bf16.mxu1 %v1652_v33  ;;  %v1666_v42 = vld [vmem:[%s2293_s1 + $0x80] ss:$16 sps:$4 sm:$0xff]   ;;  %v1667_v43 = vld [vmem:[%s2293_s1 + $0x88] ss:$16 sps:$4 sm:$0xff]   ;;  %v1668_v44 = vld [vmem:[%s2293_s1 + $0x64] ss:$16 sps:$4 sm:$0xff]  }
 0x190   : > { %v1670_v45 = vld [vmem:[%s2293_s1 + $0x6c] ss:$16 sps:$4 sm:$0xff]   ;;  %v1672_v46 = vld [vmem:[%s2293_s1 + $0x60] ss:$16 sps:$4 sm:$0xff]   ;;  %v1673_v47 = vld [vmem:[%s2293_s1 + $0x68] ss:$16 sps:$4 sm:$0xff]  }
 0x191   : > { %v1674_v48 = vld [vmem:[%s2293_s1 + $0x44] ss:$16 sps:$4 sm:$0xff]   ;;  %v1676_v49 = vld [vmem:[%s2293_s1 + $0x4c] ss:$16 sps:$4 sm:$0xff]   ;;  %v1678_v50 = vld [vmem:[%s2293_s1 + $0x40] ss:$16 sps:$4 sm:$0xff]  }
 0x192   : > { %797 = vmatpush1.bf16.msra.mxu0 %v1654_v34  ;;  %850 = vmatpush1.bf16.msra.mxu1 %v1655_v35  ;;  %v1679_v51 = vld [vmem:[%s2293_s1 + $0x48] ss:$16 sps:$4 sm:$0xff]   ;;  %v1680_v52 = vld [vmem:[%s2293_s1 + $0x24] ss:$16 sps:$4 sm:$0xff]   ;;  %v1682_v53 = vld [vmem:[%s2293_s1 + $0x2c] ss:$16 sps:$4 sm:$0xff]  }
 0x193   : > { %798 = vmatprep.subr.bf16.mxu0 %v1656_v36  ;;  %851 = vmatprep.subr.bf16.mxu1 %v1658_v37  ;;  %v1684_v54 = vld [vmem:[%s2293_s1 + $0x20] ss:$16 sps:$4 sm:$0xff]   ;;  %v1685_v55 = vld [vmem:[%s2293_s1 + $0x28] ss:$16 sps:$4 sm:$0xff]   ;;  %v1686_v56 = vld [vmem:[%s2293_s1 + $0x4] ss:$16 sps:$4 sm:$0xff]  }
 0x194   : > { %v1688_v57 = vld [vmem:[%s2293_s1 + $0xc] ss:$16 sps:$4 sm:$0xff]   ;;  %v1690_v58 = vld [vmem:[%s2293_s1] ss:$16 sps:$4 sm:$0xff]   ;;  %v1691_v59 = vld [vmem:[%s2293_s1 + $0x8] ss:$16 sps:$4 sm:$0xff]  }
 0x195   : > { %v1692_v60 = vld [vmem:[#allocation2] sm:$0xff]   ;;  %v1693_v61 = vld [vmem:[#allocation2 + $0x8] sm:$0xff]   ;;  %v603_v63 = vshrl.u32 %v602_v62, 7  ;;  %v600_v4 = vld [vmem:[%s335_s30] sm:$0xf]  ;;  %s2658_s12 = sld [smem:[#allocation18_spill]] }
 0x196   : > { %799 = vmatpush1.bf16.msra.mxu0 %v1660_v38  ;;  %852 = vmatpush1.bf16.msra.mxu1 %v1661_v39 }
 0x197   : > { %800 = vmatprep.subr.bf16.mxu0 %v1662_v40  ;;  %853 = vmatprep.subr.bf16.mxu1 %v1664_v41  ;;  %v612_v0 = vsub.s32 2, %v603_v63  ;;  %v604_v1 = vsub.s32 0, %v603_v63  ;;  %v608_v2 = vsub.s32 1, %v603_v63  ;;  %v616_v3 = vsub.s32 3, %v603_v63 }
 0x199   : > { %v613_v5 = vrot.slane %v600_v4, %v612_v0  ;;  %v605_v6 = vrot.slane %v600_v4, %v604_v1  ;;  %v609_v7 = vrot.slane %v600_v4, %v608_v2  ;;  %v617_v8 = vrot.slane %v600_v4, %v616_v3  ;;  %v2438_v0 = vld [vmem:[#allocation3 + $0x8] sm:$0xff]  ;;  %v2448_v4 = vld [vmem:[#allocation3 + $0x10] sm:$0xff] }
 0x19a   : > { %801 = vmatpush1.bf16.msra.mxu0 %v1666_v42  ;;  %854 = vmatpush1.bf16.msra.mxu1 %v1667_v43 }
 0x19b   : > { %802 = vmatprep.subr.bf16.mxu0 %v1668_v44  ;;  %855 = vmatprep.subr.bf16.mxu1 %v1670_v45  ;;  %p1401_p13 = scmp.ne.s32.totalorder %s2658_s12, 1 }
 0x19e   : > { %803 = vmatpush1.bf16.msra.mxu0 %v1672_v46  ;;  %856 = vmatpush1.bf16.msra.mxu1 %v1673_v47 }
 0x19f   : > { %804 = vmatprep.subr.bf16.mxu0 %v1674_v48  ;;  %857 = vmatprep.subr.bf16.mxu1 %v1676_v49 }
 0x1a2   : > { %805 = vmatpush1.bf16.msra.mxu0 %v1678_v50  ;;  %858 = vmatpush1.bf16.msra.mxu1 %v1679_v51 }
 0x1a3   : > { %806 = vmatprep.subr.bf16.mxu0 %v1680_v52  ;;  %859 = vmatprep.subr.bf16.mxu1 %v1682_v53 }
 0x1a6   : > { %807 = vmatpush1.bf16.msra.mxu0 %v1684_v54  ;;  %860 = vmatpush1.bf16.msra.mxu1 %v1685_v55 }
 0x1a7   : > { %808 = vmatprep.subr.bf16.mxu0 %v1686_v56  ;;  %861 = vmatprep.subr.bf16.mxu1 %v1688_v57 }
 0x1aa   : > { %809 = vmatpush1.bf16.msra.mxu0 %v1690_v58  ;;  %862 = vmatpush1.bf16.msra.mxu1 %v1691_v59 }
 0x1ad   : > { %827 = vmatmul.mubr.bf16.vlgmr.msra.gmra.mxu0 %v1692_v60  ;;  %880 = vmatmul.mubr.bf16.vlgmr.msra.gmra.mxu1 %v1692_v60 }
 0x1ae   : > { %836 = vmatprep.mubr.bf16.mxu0 %v2017_v29  ;;  %889 = vmatprep.mubr.bf16.mxu1 %v2017_v29 }
 0x1b5   : > { %837 = vmatmul.mubr.bf16.gmra.mxu0 %v1693_v61  ;;  %890 = vmatmul.mubr.bf16.gmra.mxu1 %v1693_v61  ;;  %v2433_v61 = vld [vmem:[#allocation3] sm:$0xff] }
 0x26d   : > { %v828_v9 = vpop.f32.mrf.mxu0  ;;  %v881_v10 = vpop.f32.mrf.mxu1 }
 0x26e   : > { %v2361_v11 = vadd.f32 %v881_v10, %v613_v5  ;;  %v2363_v14 = vadd.f32 %v828_v9, %v605_v6 }
 0x26f   : > { %v830_v12 = vpop.f32.mrf.mxu0  ;;  %v883_v13 = vpop.f32.mrf.mxu1 }
 0x270   : > { %v2365_v15 = vadd.f32 %v830_v12, %v609_v7  ;;  %v2367_v16 = vadd.f32 %v883_v13, %v617_v8 }
 0x271   : > { %v832_v17 = vpop.f32.mrf.mxu0  ;;  %v885_v18 = vpop.f32.mrf.mxu1 }
 0x272   : > { %v1416_v19 = vpack.c.bf16 %v2365_v15, %v2363_v14  ;;  %v1417_v20 = vpack.c.bf16 %v2367_v16, %v2361_v11  ;;  %v960_v23 = vmax.f32 %v2363_v14, %v2365_v15  ;;  %v2377_v24 = vadd.f32 %v832_v17, %v605_v6 }
 0x273   : > { %v834_v21 = vpop.f32.mrf.mxu0  ;;  %v887_v22 = vpop.f32.mrf.mxu1  ;;  %v2379_v25 = vadd.f32 %v885_v18, %v613_v5 }
 0x274   : > { %948 = vst [vmem:[%s2311_s8] sm:$0xff] %v1416_v19  ;;  %949 = vst [vmem:[%s2311_s8 + $0x8] sm:$0xff] %v1417_v20  ;;  %v2381_v26 = vadd.f32 %v834_v21, %v609_v7  ;;  %v2383_v27 = vadd.f32 %v887_v22, %v617_v8  ;;  %v961_v30 = vmax.f32 %v960_v23, %v2361_v11 }
 0x275   : > { %v838_v28 = vpop.f32.mrf.mxu0  ;;  %v891_v29 = vpop.f32.mrf.mxu1 }
 0x276   : > { %v1418_v31 = vpack.c.bf16 %v2381_v26, %v2377_v24  ;;  %v965_v32 = vmax.f32 %v2377_v24, %v2381_v26  ;;  %v1419_v33 = vpack.c.bf16 %v2383_v27, %v2379_v25  ;;  %v2392_v34 = vadd.f32 %v891_v29, %v613_v5 }
 0x277   : > { %v840_v35 = vpop.f32.mrf.mxu0  ;;  %v893_v36 = vpop.f32.mrf.mxu1  ;;  %v962_v37 = vmax.f32 %v961_v30, %v2367_v16  ;;  %v2397_v38 = vadd.f32 %v838_v28, %v605_v6 }
 0x278   : > { %950 = vst [vmem:[%s2311_s8 + $0x10] sm:$0xff] %v1418_v31  ;;  %951 = vst [vmem:[%s2311_s8 + $0x18] sm:$0xff] %v1419_v33  ;;  %v2399_v39 = vadd.f32 %v840_v35, %v609_v7  ;;  %v2401_v40 = vadd.f32 %v893_v36, %v617_v8  ;;  %v966_v41 = vmax.f32 %v965_v32, %v2379_v25 }
 0x279   : > { %963 = vmax.xlane.f32.xlu0 %v962_v37  ;;  %v842_v42 = vpop.f32.mrf.mxu0  ;;  %v895_v43 = vpop.f32.mrf.mxu1 }
 0x27a   : > { %v1420_v44 = vpack.c.bf16 %v2399_v39, %v2397_v38  ;;  %v1421_v45 = vpack.c.bf16 %v2401_v40, %v2392_v34  ;;  %v967_v48 = vmax.f32 %v966_v41, %v2383_v27  ;;  %v970_v49 = vmax.f32 %v2397_v38, %v2399_v39 }
 0x27b   : > { %v844_v46 = vpop.f32.mrf.mxu0  ;;  %v897_v47 = vpop.f32.mrf.mxu1  ;;  %v2413_v50 = vadd.f32 %v842_v42, %v605_v6  ;;  %v2415_v51 = vadd.f32 %v895_v43, %v613_v5 }
 0x27c   : > { %952 = vst [vmem:[%s2311_s8 + $0x20] sm:$0xff] %v1420_v44  ;;  %953 = vst [vmem:[%s2311_s8 + $0x28] sm:$0xff] %v1421_v45  ;;  %v2417_v52 = vadd.f32 %v844_v46, %v609_v7  ;;  %v2419_v53 = vadd.f32 %v897_v47, %v617_v8  ;;  %v971_v54 = vmax.f32 %v970_v49, %v2392_v34  ;;  %v2458_v8 = vld [vmem:[#allocation3 + $0x18] sm:$0xff] }
 0x27d   : > { %968 = vmax.xlane.f32.xlu0 %v967_v48 }
 0x27e   : > { %v1422_v55 = vpack.c.bf16 %v2417_v52, %v2413_v50  ;;  %v975_v56 = vmax.f32 %v2413_v50, %v2417_v52  ;;  %v1423_v57 = vpack.c.bf16 %v2419_v53, %v2415_v51  ;;  %v972_v58 = vmax.f32 %v971_v54, %v2401_v40 }
 0x280   : > { %954 = vst [vmem:[%s2311_s8 + $0x30] sm:$0xff] %v1422_v55  ;;  %955 = vst [vmem:[%s2311_s8 + $0x38] sm:$0xff] %v1423_v57  ;;  %v976_v59 = vmax.f32 %v975_v56, %v2415_v51  ;;  %973 = vmax.xlane.f32.xlu1 %v972_v58 }
 0x282   : > { %v977_v60 = vmax.f32 %v976_v59, %v2419_v53 }
 0x284   : > { %978 = vmax.xlane.f32.xlu1 %v977_v60 }
 0x302   : > { %v964_v62 = vpop.xlane.xlu0 %963 }
 0x303   : > { %v2436_v63 = vmax.f32 %v2433_v61, %v964_v62 }
 0x305   : > { %v988_v1 = vsub.f32 %v2433_v61, %v2436_v63  ;;  %1101 = vst.msk [vmem:[#allocation3] sm:$0xff] %vm1096_vm1, %v2436_v63  ;;  %1006 = vperm.xlu0 %1642, %v2436_v63  }
 0x306   : > { %v969_v2 = vpop.xlane.xlu0 %968 }
 0x307   : > { %v2446_v3 = vmax.f32 %v2438_v0, %v969_v2 }
 0x309   : > { %v989_v5 = vsub.f32 %v2438_v0, %v2446_v3  ;;  %1102 = vst.msk [vmem:[#allocation3 + $0x8] sm:$0xff] %vm1096_vm1, %v2446_v3  ;;  %1011 = vperm.xlu1 %1643, %v2446_v3   ;;  %v974_v6 = vpop.xlane.xlu1 %973 }
 0x30a   : > { %v2456_v7 = vmax.f32 %v2448_v4, %v974_v6 }
 0x30c   : > { %v990_v9 = vsub.f32 %v2448_v4, %v2456_v7  ;;  %1103 = vst.msk [vmem:[#allocation3 + $0x10] sm:$0xff] %vm1096_vm1, %v2456_v7  ;;  %v986_v4 = vld [vmem:[#allocation4 + $0x10] sm:$0xff] }
 0x30d   : > { %1016 = vperm.xlu1 %1643, %v2456_v7   ;;  %v979_v10 = vpop.xlane.xlu1 %978 }
 0x30e   : > { %v2466_v12 = vmax.f32 %v2458_v8, %v979_v10 }
 0x310   : > { %v991_v13 = vsub.f32 %v2458_v8, %v2466_v12  ;;  %1104 = vst.msk [vmem:[#allocation3 + $0x18] sm:$0xff] %vm1096_vm1, %v2466_v12 }
 0x311   : > { %1021 = vperm.xlu1 %1643, %v2466_v12  }
 0x380   : > { %v1007_v17 = vpop.permute.xlu0 %1006 }
 0x381   : > { %v1024_v18 = vsub.f32 %v2363_v14, %v1007_v17  ;;  %v1025_v19 = vsub.f32 %v2365_v15, %v1007_v17  ;;  %v1026_v20 = vsub.f32 %v2361_v11, %v1007_v17  ;;  %v1027_v21 = vsub.f32 %v2367_v16, %v1007_v17 }
 0x383   : > { %v1040_v22 = vmul.f32 1.442695, %v1024_v18  ;;  %v1042_v23 = vmul.f32 1.442695, %v1025_v19  ;;  %v1044_v28 = vmul.f32 1.442695, %v1026_v20 }
 0x384   : > { %v1046_v29 = vmul.f32 1.442695, %v1027_v21  ;;  %v1012_v30 = vpop.permute.xlu1 %1011 }
 0x385   : > { %1694 = vpow2.f32 %v1040_v22  ;;  %v1028_v31 = vsub.f32 %v2377_v24, %v1012_v30  ;;  %v1029_v32 = vsub.f32 %v2381_v26, %v1012_v30  ;;  %v1030_v33 = vsub.f32 %v2379_v25, %v1012_v30 }
 0x386   : > { %1696 = vpow2.f32 %v1042_v23  ;;  %v1031_v14 = vsub.f32 %v2383_v27, %v1012_v30 }
 0x387   : > { %1698 = vpow2.f32 %v1044_v28  ;;  %v1048_v15 = vmul.f32 1.442695, %v1028_v31  ;;  %v1050_v11 = vmul.f32 1.442695, %v1029_v32  ;;  %v1052_v35 = vmul.f32 1.442695, %v1030_v33 }
 0x388   : > { %1700 = vpow2.f32 %v1046_v29  ;;  %v1054_v16 = vmul.f32 1.442695, %v1031_v14  ;;  %v1017_v36 = vpop.permute.xlu1 %1016  ;;  %v992_v33 = vmul.f32 1.442695, %v988_v1  ;;  %v994_v14 = vmul.f32 1.442695, %v989_v5 }
 0x389   : > { %1702 = vpow2.f32 %v1048_v15  ;;  %v1032_v37 = vsub.f32 %v2397_v38, %v1017_v36  ;;  %v1033_v41 = vsub.f32 %v2399_v39, %v1017_v36  ;;  %v1034_v24 = vsub.f32 %v2392_v34, %v1017_v36 }
 0x38a   : > { %1704 = vpow2.f32 %v1050_v11  ;;  %v1035_v25 = vsub.f32 %v2401_v40, %v1017_v36  ;;  %v996_v15 = vmul.f32 1.442695, %v990_v9  ;;  %v998_v11 = vmul.f32 1.442695, %v991_v13  ;;  %v985_v36 = vld [vmem:[#allocation4 + $0x8] sm:$0xff]  ;;  %v987_v13 = vld [vmem:[#allocation4 + $0x18] sm:$0xff] }
 0x38b   : > { %1706 = vpow2.f32 %v1052_v35  ;;  %v1056_v26 = vmul.f32 1.442695, %v1032_v37  ;;  %v1058_v27 = vmul.f32 1.442695, %v1033_v41  ;;  %v1060_v42 = vmul.f32 1.442695, %v1034_v24 }
 0x38c   : > { %1708 = vpow2.f32 %v1054_v16  ;;  %v1062_v43 = vmul.f32 1.442695, %v1035_v25  ;;  %v1022_v44 = vpop.permute.xlu1 %1021  ;;  %v984_v16 = vld [vmem:[#allocation4] sm:$0xff] }
 0x38d   : > { %1710 = vpow2.f32 %v1056_v26  ;;  %v1036_v45 = vsub.f32 %v2413_v50, %v1022_v44  ;;  %v1037_v46 = vsub.f32 %v2417_v52, %v1022_v44  ;;  %v1038_v38 = vsub.f32 %v2415_v51, %v1022_v44 }
 0x38e   : > { %1712 = vpow2.f32 %v1058_v27  ;;  %v1039_v34 = vsub.f32 %v2419_v53, %v1022_v44 }
 0x38f   : > { %1714 = vpow2.f32 %v1060_v42  ;;  %v1064_v39 = vmul.f32 1.442695, %v1036_v45  ;;  %v1066_v40 = vmul.f32 1.442695, %v1037_v46  ;;  %v1068_v47 = vmul.f32 1.442695, %v1038_v38 }
 0x390   : > { %1716 = vpow2.f32 %v1062_v43  ;;  %v1070_v49 = vmul.f32 1.442695, %v1039_v34 }
 0x391   : > { %1718 = vpow2.f32 %v1064_v39 }
 0x392   : > { %v1695_v48 = vpop.eup %1694  ;;  %1720 = vpow2.f32 %v1066_v40 }
 0x393   : > { %v1697_v54 = vpop.eup %1696  ;;  %1722 = vpow2.f32 %v1068_v47 }
 0x394   : > { %v1699_v55 = vpop.eup %1698  ;;  %v1072_v50 = vadd.f32 %v1697_v54, %v1695_v48  ;;  %1724 = vpow2.f32 %v1070_v49 }
 0x395   : > { %v1701_v56 = vpop.eup %1700  ;;  %1726 = vpow2.f32 %v992_v33 }
 0x396   : > { %v1703_v52 = vpop.eup %1702  ;;  %v1073_v51 = vadd.f32 %v1699_v55, %v1072_v50  ;;  %1728 = vpow2.f32 %v994_v14 }
 0x397   : > { %v1705_v57 = vpop.eup %1704  ;;  %1730 = vpow2.f32 %v996_v15 }
 0x398   : > { %v1707_v58 = vpop.eup %1706  ;;  %v1074_v53 = vadd.f32 %v1701_v56, %v1073_v51  ;;  %v1077_v59 = vadd.f32 %v1705_v57, %v1703_v52  ;;  %1732 = vpow2.f32 %v998_v11 }
 0x399   : > { %v1709_v60 = vpop.eup %1708 }
 0x39a   : > { %v1711_v62 = vpop.eup %1710  ;;  %1075 = vadd.xlane.f32.xlu1 %v1074_v53  ;;  %v1078_v2 = vadd.f32 %v1707_v58, %v1077_v59 }
 0x39b   : > { %v1713_v6 = vpop.eup %1712 }
 0x39c   : > { %v1715_v10 = vpop.eup %1714  ;;  %v1079_v17 = vadd.f32 %v1709_v60, %v1078_v2  ;;  %v1082_v18 = vadd.f32 %v1713_v6, %v1711_v62 }
 0x39d   : > { %v1717_v19 = vpop.eup %1716 }
 0x39e   : > { %v1719_v20 = vpop.eup %1718  ;;  %1080 = vadd.xlane.f32.xlu0 %v1079_v17  ;;  %v1083_v21 = vadd.f32 %v1715_v10, %v1082_v18 }
 0x39f   : > { %v1721_v22 = vpop.eup %1720 }
 0x3a0   : > { %v1084_v23 = vadd.f32 %v1717_v19, %v1083_v21  ;;  %v1087_v28 = vadd.f32 %v1721_v22, %v1719_v20  ;;  %v1723_v29 = vpop.eup %1722 }
 0x3a1   : > { %v1725_v31 = vpop.eup %1724 }
 0x3a2   : > { %1085 = vadd.xlane.f32.xlu1 %v1084_v23  ;;  %v1088_v30 = vadd.f32 %v1723_v29, %v1087_v28  ;;  %v1727_v35 = vpop.eup %1726 }
 0x3a3   : > { %v1000_v61 = vmul.f32 %v1727_v35, %v984_v16  ;;  %v1729_v63 = vpop.eup %1728 }
 0x3a4   : > { %v1089_v32 = vadd.f32 %v1725_v31, %v1088_v30  ;;  %v1001_v0 = vmul.f32 %v1729_v63, %v985_v36  ;;  %v1731_v3 = vpop.eup %1730 }
 0x3a5   : > { %v1002_v9 = vmul.f32 %v1731_v3, %v986_v4  ;;  %v1733_v8 = vpop.eup %1732 }
 0x3a6   : > { %1090 = vadd.xlane.f32.xlu1 %v1089_v32  ;;  %v1003_v24 = vmul.f32 %v1733_v8, %v987_v13 }
 0x423   : > { %v1076_v1 = vpop.xlane.xlu1 %1075 }
 0x424   : > { %v1092_v37 = vadd.f32 %v1076_v1, %v1000_v61 }
 0x426   : > { %1097 = vst.msk [vmem:[#allocation4] sm:$0xff] %vm1096_vm1, %v1092_v37 }
 0x427   : > { %v1081_v5 = vpop.xlane.xlu0 %1080 }
 0x428   : > { %v1093_v7 = vadd.f32 %v1081_v5, %v1001_v0 }
 0x42a   : > { %1098 = vst.msk [vmem:[#allocation4 + $0x8] sm:$0xff] %vm1096_vm1, %v1093_v7 }
 0x42b   : > { %v1086_v12 = vpop.xlane.xlu1 %1085 }
 0x42c   : > { %v1094_v41 = vadd.f32 %v1086_v12, %v1002_v9 }
 0x42e   : > { %1099 = vst.msk [vmem:[#allocation4 + $0x10] sm:$0xff] %vm1096_vm1, %v1094_v41  ;;  %1108 = sbr.rel (%p1401_p13) target bundleno = 1101 (0x44d), region = 64 }
 0x42f   : > { %v1091_v25 = vpop.xlane.xlu1 %1090 }
 0x430   : > { %v1095_v26 = vadd.f32 %v1091_v25, %v1003_v24 }
 0x432   : > { %1100 = vst.msk [vmem:[#allocation4 + $0x18] sm:$0xff] %vm1096_vm1, %v1095_v26 }
 0x433   : > { %v1113_v27 = vld [vmem:[#allocation4] sm:$0xff]  ;;  %v1114_v42 = vld [vmem:[#allocation4 + $0x8] sm:$0xff]  ;;  %v1111_v48 = vld [vmem:[#allocation3 + $0x10] sm:$0xff] }
 0x434   : > { %1734 = vlog2.f32 %v1113_v27  ;;  %v1109_v46 = vld [vmem:[#allocation3] sm:$0xff]  ;;  %v1110_v39 = vld [vmem:[#allocation3 + $0x8] sm:$0xff]  ;;  %v1112_v50 = vld [vmem:[#allocation3 + $0x18] sm:$0xff] }
 0x435   : > { %v1115_v43 = vld [vmem:[#allocation4 + $0x10] sm:$0xff]  ;;  %1736 = vlog2.f32 %v1114_v42 }
 0x436   : > { %1738 = vlog2.f32 %v1115_v43 }
 0x439   : > { %v1116_v44 = vld [vmem:[#allocation4 + $0x18] sm:$0xff] }
 0x43a   : > { %1740 = vlog2.f32 %v1116_v44 }
 0x441   : > { %v1735_v45 = vpop.eup %1734 }
 0x442   : > { %v1737_v38 = vpop.eup %1736  ;;  %v1118_v34 = vmul.f32 0.6931472, %v1735_v45 }
 0x443   : > { %v1739_v40 = vpop.eup %1738  ;;  %v1120_v47 = vmul.f32 0.6931472, %v1737_v38 }
 0x444   : > { %v1125_v54 = vadd.f32 %v1118_v34, %v1109_v46  ;;  %v1122_v55 = vmul.f32 0.6931472, %v1739_v40 }
 0x445   : > { %v1126_v56 = vadd.f32 %v1120_v47, %v1110_v39 }
 0x446   : > { %1129 = vst.msk [vmem:[%s2308_s9] sm:$0xff] %vm1096_vm1, %v1125_v54  ;;  %v1127_v51 = vadd.f32 %v1122_v55, %v1111_v48 }
 0x447   : > { %v1741_v49 = vpop.eup %1740  ;;  %1130 = vst.msk [vmem:[%s2308_s9 + $0x8] sm:$0xff] %vm1096_vm1, %v1126_v56 }
 0x448   : > { %v1124_v52 = vmul.f32 0.6931472, %v1741_v49  ;;  %1131 = vst.msk [vmem:[%s2308_s9 + $0x10] sm:$0xff] %vm1096_vm1, %v1127_v51 }
 0x44a   : > { %v1128_v57 = vadd.f32 %v1124_v52, %v1112_v50 }
 0x44c   : > { %1132 = vst.msk [vmem:[%s2308_s9 + $0x18] sm:$0xff] %vm1096_vm1, %v1128_v57 }
 0x44d PF: > { %s2659_s18 = sld [smem:[#allocation18_spill]]  ;;  %s1155_s21 = sshll.u32 %s2311_s8, 4  ;;  %s2517_s21 = int_to_ptr.vmem [resolvable:$true] %s1155_s21 }
 0x44e   : > { %s2660_s1 = sld [smem:[#allocation19_spill]]  ;;  %s2526_s30 = scalar_lea.sflag [#allocation7], %s369_s15 }
 0x44f   : > { %s2661_s7 = sld [smem:[#allocation29_spill]]  ;;  %s1852_s17 = scalar_lea.vmem %s2517_s21, 1024 }
 0x450   : > { %p1853_p0 = scmp.ne.s32.totalorder %s2517_s21, %s1852_s17  ;;  %p2663_p4 = scmp.ne.s32.totalorder %s2642_s2, 0 }
 0x451   : > { %s2018_s8 = smov [#allocation12]  }
 0x452   : > { %p1854_p8 = pnand %p1853_p0, %p2663_p4  ;;  %s1856_s3 = sshll.u32 %s2018_s8, 4  ;;  %s1857_s3 = int_to_ptr.vmem [resolvable:$false] %s1856_s3 }
 0x453   : > { %s1404_s14 = sshll.u32 %s2659_s18, 2  ;;  %s1858_s13 = scalar_lea.vmem %s1857_s3, 2048 }
 0x454   : > { %s1424_s27 = sshll.u32 %s2660_s1, 5  ;;  %p1855_p2 = pneg %p1854_p8 }
 0x455   : > { %s1152_s6 = sadd.s32 %s1424_s27, %s1404_s14  ;;  %s2662_s19 = smov %s2661_s7 }
 0x456   : > { %s1406_s5 = sshll.u32 %s1152_s6, 6  ;;  %p1859_p9 = scmp.lt.s32.totalorder %s2517_s21, %s1857_s3 }
 0x457   : > { %s2522_s9 = scalar_lea.hbm %s2661_s7, %s1406_s5  ;;  %p1860_p11 = scmp.lt.s32.totalorder %s1858_s13, %s1852_s17 }
 0x459   : > { %p1861_p12 = por %p1860_p11, %p1859_p9 }
 0x45b   : > { %p1862_p3 = pnand %p1861_p12, %p1855_p2 }
 0x45d   : > { %1865 = shalt.err (!%p1862_p3)
}
 0x45e   : > { %s1866_s15 = scalar_lea.hbm %s2522_s9, 1024  ;;  %s1870_s1 = scalar_lea.hbm %s2662_s19, 4096 }
 0x45f   : > { %p1867_p10 = scmp.ne.s32.totalorder %s2522_s9, %s1866_s15  ;;  %p1871_p7 = scmp.lt.s32.totalorder %s2522_s9, %s2662_s19 }
 0x460   : > { %p1872_p6 = scmp.lt.s32.totalorder %s1870_s1, %s1866_s15 }
 0x461   : > { %p1868_p5 = pnand %p1867_p10, %p2663_p4 }
 0x462   : > { %p1873_p13 = por %p1872_p6, %p1871_p7 }
 0x463   : > { %p1869_p1 = pneg %p1868_p5 }
 0x465   : > { %p1874_p0 = pnand %p1873_p13, %p1869_p1 }
 0x467   : > { %1877 = shalt.err (!%p1874_p0)
}
 0x468   : > { %s2019_s6 = smov 256   ;;  %s2020_s5 = smov 512  }
 0x469   : > { %s2021_s0 = smov 16  }
 0x46a   : > { %1476 = dma.vmem_to_hbm [thread:$0]  (%p2663_p4), %s2517_s21, 1024, %s2522_s9, %s2526_s30, %s2019_s6, %s2020_s5, %s2021_s0  }
 0x46b PF: > { %s2664_s4 = sld [smem:[#allocation17_spill]]  ;;  %p1499_p8 = scmp.ge.s32.totalorder %s2004_s10, 2 }
 0x46c   : > { %p2665_p2 = scmp.ne.s32.totalorder %s2643_s24, 0 }
 0x46e   : > { %p1493_p9 = pnand %p1499_p8, %p2665_p2 }
 0x470   : > { %p1494_p11 = pneg %p1493_p9 }
 0x471   : > { %s1174_s7 = sand.u32 1, %s2664_s4  }
 0x472   : > { %s1175_s17 = scalar_lea.sflag [#allocation7], %s1174_s7 }
 0x473   : > { %1947 = dma.done.wait (%p1494_p11), %s1175_s17, 1024  }
 0x474   : > { %1949 = vsyncadd (%p1494_p11), %s1175_s17, 4294966272  ;;  %s24_s10 = sadd.s32 1, %s2004_s10   ;;  %s2667_s30 = sld [smem:[#allocation20_spill]] }
 0x475   : > { %p2554_p12 = scmp.ge.s32.totalorder %s24_s10, 6   ;;  %s2668_s7 = sld [smem:[#allocation21_spill]] }
 0x476   : > { %s2669_s2 = sld [smem:[#allocation22_spill]]  ;;  %s2672_s21 = smov %s1956_s22 }
 0x477   : > { %s2670_s9 = sld [smem:[#allocation23_spill]]  ;;  %s2673_s22 = smov %s1960_s23 }
 0x478   : > { %s2674_s23 = smov %s2159_s11  ;;  %s2675_s24 = smov %s1968_s25 }
 0x479   : > { %s2676_s25 = smov %s1972_s26  ;;  %s2677_s26 = smov %s2190_s16 }
 0x47a   : > { %s2678_s27 = smov %s1980_s28  ;;  %s2679_s28 = smov %s1984_s29 }
 0x47b   : > { %s2680_s29 = smov %s2156_s20  ;;  %23 = sbr.rel (!%p2554_p12) target bundleno = 19 (0x13), region = 131 }
 0x47c   : > { %s2681_s8 = smov %s2669_s2 }
 0x480   :  { %1188 = vsyncpa [#allocation6], 1 }
 0x481   :  { %1190 = vsyncpa [#allocation6 + $0x1], 1 }
 0x482   :  { %1191 = vsyncpa [#allocation9], 1 }
 0x483   :  { %1192 = vsyncpa [#allocation7], 1 }
 0x484   :  { %1194 = vsyncpa [#allocation7 + $0x1], 1 }

</bundles_post_ra>
